<compile_context>
chip_gen: v5e
topology: v5e:2x2
jax: 0.10.0
libtpu: 0.0.40
codegen_flags: <defaults>
</compile_context>

<pallas_src>
import jax
import jax.numpy as jnp
from jax.experimental import pallas as pl
from jax.experimental.pallas import tpu as pltpu


_CK_CHUNK = 8  # one f32 sublane group


def _lc2d_kernel(xw_ref, w_ref, o_ref):
    """One (P-tile, batch-element) grid step.

    xw_ref: (1, CKp, TP)   window values for one batch element (CK on sublanes)
    w_ref : (OC, CKp, TP)  locally-connected weight tile (shared across batch)
    o_ref : (1, OC, TP)    output tile (lane-dense, P on lanes)
    """
    oc_n, ckp, _ = w_ref.shape
    n_chunks = ckp // _CK_CHUNK
    for oc in range(oc_n):                       # small static unroll (OC)
        row = None
        for c in range(n_chunks):                # chunked CK accumulation
            lo = c * _CK_CHUNK
            part = jnp.sum(
                w_ref[oc, lo:lo + _CK_CHUNK, :] * xw_ref[0, lo:lo + _CK_CHUNK, :],
                axis=0,
                keepdims=True,
            )                                    # (1, TP)
            row = part if row is None else row + part
        o_ref[0, oc:oc + 1, :] = row             # lane-dense unmasked store


def _extract_windows(x, kernel_size, stride):
    """Reproduce torch.unfold(2, kh, dh).unfold(3, kw, dw) + flatten last two dims.

    x: (N, C, H, W) -> (N, C, OH, OW, kh*kw)
    """
    kh, kw = kernel_size
    dh, dw = stride
    N, C, H, W = x.shape
    OH = (H - kh) // dh + 1
    OW = (W - kw) // dw + 1
    patches = []
    for i in range(kh):
        for j in range(kw):
            patches.append(
                x[:, :, i: i + (OH - 1) * dh + 1: dh,
                        j: j + (OW - 1) * dw + 1: dw]
            )
    # stack in (i, j) row-major order, matching torch's contiguous view of (kh, kw)
    xw = jnp.stack(patches, axis=-1)     # (N, C, OH, OW, K)
    return xw, OH, OW


def _round_up(v, m):
    return ((v + m - 1) // m) * m


def locally_connected_2d(x, weight, kernel_size, stride, bias=None, p_tile=128):
    """x: (N, C, H, W) f32; weight: (1, OC, C, OH, OW, K). Returns (N, OC, OH, OW)."""
    N, C, H, W = x.shape
    kh, kw = kernel_size
    K = kh * kw
    # TODO(synk): build the unfolded windows inside the kernel from (C, H, W)
    # VMEM tiles (static slices) instead of materializing the K-times-duplicated
    # window tensor in HBM here; at small N the weight read dominates, but for
    # large H*W / N this wrapper unfold is wasted HBM bandwidth.
    xw, OH, OW = _extract_windows(x, kernel_size, stride)   # (N, C, OH, OW, K)
    OC = weight.shape[1]
    P = OH * OW
    CK = C * K

    # Re-layout: reduction axis (C, K) on sublanes, positions P on lanes.
    xw_flat = jnp.transpose(xw, (0, 1, 4, 2, 3)).reshape(N, CK, P)          # (N, CK, P)
    w_flat = jnp.transpose(weight[0], (0, 1, 4, 2, 3)).reshape(OC, CK, P)   # (OC, CK, P)

    # Zero-pad: CK -> multiple of 8 (sublane), P -> multiple of p_tile (lane).
    # Zero padding contributes nothing to the sum; padded P columns are sliced off.
    CKp = _round_up(CK, _CK_CHUNK)
    Pp = _round_up(P, p_tile)
    xw_pad = jnp.pad(xw_flat, ((0, 0), (0, CKp - CK), (0, Pp - P)))
    w_pad = jnp.pad(w_flat, ((0, 0), (0, CKp - CK), (0, Pp - P)))

    # P-tile axis outermost: the weight block index only depends on it, so each
    # weight tile is fetched once and reused across all N inner iterations.
    grid = (Pp // p_tile, N)

    out_pad = pl.pallas_call(
        _lc2d_kernel,
        out_shape=jax.ShapeDtypeStruct((N, OC, Pp), jnp.float32),
        grid_spec=pltpu.PrefetchScalarGridSpec(
            num_scalar_prefetch=0,
            grid=grid,
            in_specs=[
                pl.BlockSpec((1, CKp, p_tile), lambda p, n: (n, 0, p)),
                pl.BlockSpec((OC, CKp, p_tile), lambda p, n: (0, 0, p)),
            ],
            out_specs=pl.BlockSpec((1, OC, p_tile), lambda p, n: (n, 0, p)),
        ),
        compiler_params=pltpu.CompilerParams(
            dimension_semantics=("parallel", "parallel"),
            # Explicit, conservative budget: tiles here are a few hundred KiB,
            # well inside v7x's 64 MiB physical / 32 MiB scoped VMEM.
            vmem_limit_bytes=32 * 1024 * 1024,
        ),
    )(xw_pad, w_pad)

    out = out_pad[:, :, :P].reshape(N, OC, OH, OW)
    if bias is not None:
        # PyTorch module's bias is (1, OC, OH, OW): per-output-position bias,
        # broadcast over the batch dimension.
        out = out + bias
    return out


if __name__ == "__main__":
    # Module config (bias=False path, as in the PyTorch __init__ default usage)
    N, C, H, W = 2, 4, 16, 16
    OC = 8
    kernel_size = (3, 3)
    stride = (1, 1)
    kh, kw = kernel_size
    dh, dw = stride
    OH = (H - kh) // dh + 1
    OW = (W - kw) // dw + 1
    K = kh * kw

    key = jax.random.PRNGKey(0)
    kx, kw_key = jax.random.split(key)
    x = jax.random.normal(kx, (N, C, H, W), dtype=jnp.float32)
    # weight ~ torch.randn(1, OC, C, OH, OW, K) -- deterministic synthetic init
    weight = jax.random.normal(kw_key, (1, OC, C, OH, OW, K), dtype=jnp.float32)

    out = locally_connected_2d(x, weight, kernel_size, stride)
    out = jax.block_until_ready(out)

    # Pure-JAX reference for sanity (same math as the PyTorch forward).
    xw_ref, _, _ = _extract_windows(x, kernel_size, stride)           # (N, C, OH, OW, K)
    ref = jnp.sum(xw_ref[:, None] * weight, axis=(2, -1))             # (N, OC, OH, OW)
    assert out.shape == (N, OC, OH, OW)
    assert jnp.allclose(out, ref, atol=1e-4, rtol=1e-4)

    print("KERNEL_OK")
</pallas_src>

<mosaic_0001>
module attributes {stable_mosaic.version = 11 : i64} {
  func.func @_lc2d_kernel(%arg0: i32, %arg1: i32, %arg2: memref<1x40x128xf32, #tpu.memory_space<vmem>>, %arg3: memref<8x40x128xf32, #tpu.memory_space<vmem>>, %arg4: memref<1x8x128xf32, #tpu.memory_space<vmem>>) attributes {dimension_semantics = [#tpu.dimension_semantics<parallel>, #tpu.dimension_semantics<parallel>], iteration_bounds = array<i64: 2, 2>, scalar_prefetch = 0 : i64, scratch_operands = 0 : i64, tpu.core_type = #tpu.core_type<tc>, window_params = [{transform_indices = @transform_0, window_bounds = array<i64: 1, 40, 128>}, {transform_indices = @transform_1, window_bounds = array<i64: 8, 40, 128>}, {transform_indices = @transform_2, window_bounds = array<i64: 1, 8, 128>}]} {
    %c0 = arith.constant 0 : index
    %c0_0 = arith.constant 0 : index
    %c0_1 = arith.constant 0 : index
    %0 = vector.load %arg3[%c0, %c0_0, %c0_1] : memref<8x40x128xf32, #tpu.memory_space<vmem>>, vector<1x8x128xf32>
    %1 = vector.shape_cast %0 : vector<1x8x128xf32> to vector<8x128xf32>
    %c0_2 = arith.constant 0 : index
    %c0_3 = arith.constant 0 : index
    %c0_4 = arith.constant 0 : index
    %2 = vector.load %arg2[%c0_2, %c0_3, %c0_4] : memref<1x40x128xf32, #tpu.memory_space<vmem>>, vector<1x8x128xf32>
    %3 = vector.shape_cast %2 : vector<1x8x128xf32> to vector<8x128xf32>
    %4 = arith.mulf %1, %3 : vector<8x128xf32>
    %cst = arith.constant dense<0.000000e+00> : vector<128xf32>
    %5 = vector.multi_reduction <add>, %4, %cst [0] : vector<8x128xf32> to vector<128xf32>
    %6 = vector.shape_cast %5 : vector<128xf32> to vector<1x128xf32>
    %c0_5 = arith.constant 0 : index
    %c8 = arith.constant 8 : index
    %c0_6 = arith.constant 0 : index
    %7 = vector.load %arg3[%c0_5, %c8, %c0_6] : memref<8x40x128xf32, #tpu.memory_space<vmem>>, vector<1x8x128xf32>
    %8 = vector.shape_cast %7 : vector<1x8x128xf32> to vector<8x128xf32>
    %c0_7 = arith.constant 0 : index
    %c8_8 = arith.constant 8 : index
    %c0_9 = arith.constant 0 : index
    %9 = vector.load %arg2[%c0_7, %c8_8, %c0_9] : memref<1x40x128xf32, #tpu.memory_space<vmem>>, vector<1x8x128xf32>
    %10 = vector.shape_cast %9 : vector<1x8x128xf32> to vector<8x128xf32>
    %11 = arith.mulf %8, %10 : vector<8x128xf32>
    %cst_10 = arith.constant dense<0.000000e+00> : vector<128xf32>
    %12 = vector.multi_reduction <add>, %11, %cst_10 [0] : vector<8x128xf32> to vector<128xf32>
    %13 = vector.shape_cast %12 : vector<128xf32> to vector<1x128xf32>
    %14 = arith.addf %6, %13 : vector<1x128xf32>
    %c0_11 = arith.constant 0 : index
    %c16 = arith.constant 16 : index
    %c0_12 = arith.constant 0 : index
    %15 = vector.load %arg3[%c0_11, %c16, %c0_12] : memref<8x40x128xf32, #tpu.memory_space<vmem>>, vector<1x8x128xf32>
    %16 = vector.shape_cast %15 : vector<1x8x128xf32> to vector<8x128xf32>
    %c0_13 = arith.constant 0 : index
    %c16_14 = arith.constant 16 : index
    %c0_15 = arith.constant 0 : index
    %17 = vector.load %arg2[%c0_13, %c16_14, %c0_15] : memref<1x40x128xf32, #tpu.memory_space<vmem>>, vector<1x8x128xf32>
    %18 = vector.shape_cast %17 : vector<1x8x128xf32> to vector<8x128xf32>
    %19 = arith.mulf %16, %18 : vector<8x128xf32>
    %cst_16 = arith.constant dense<0.000000e+00> : vector<128xf32>
    %20 = vector.multi_reduction <add>, %19, %cst_16 [0] : vector<8x128xf32> to vector<128xf32>
    %21 = vector.shape_cast %20 : vector<128xf32> to vector<1x128xf32>
    %22 = arith.addf %14, %21 : vector<1x128xf32>
    %c0_17 = arith.constant 0 : index
    %c24 = arith.constant 24 : index
    %c0_18 = arith.constant 0 : index
    %23 = vector.load %arg3[%c0_17, %c24, %c0_18] : memref<8x40x128xf32, #tpu.memory_space<vmem>>, vector<1x8x128xf32>
    %24 = vector.shape_cast %23 : vector<1x8x128xf32> to vector<8x128xf32>
    %c0_19 = arith.constant 0 : index
    %c24_20 = arith.constant 24 : index
    %c0_21 = arith.constant 0 : index
    %25 = vector.load %arg2[%c0_19, %c24_20, %c0_21] : memref<1x40x128xf32, #tpu.memory_space<vmem>>, vector<1x8x128xf32>
    %26 = vector.shape_cast %25 : vector<1x8x128xf32> to vector<8x128xf32>
    %27 = arith.mulf %24, %26 : vector<8x128xf32>
    %cst_22 = arith.constant dense<0.000000e+00> : vector<128xf32>
    %28 = vector.multi_reduction <add>, %27, %cst_22 [0] : vector<8x128xf32> to vector<128xf32>
    %29 = vector.shape_cast %28 : vector<128xf32> to vector<1x128xf32>
    %30 = arith.addf %22, %29 : vector<1x128xf32>
    %c0_23 = arith.constant 0 : index
    %c32 = arith.constant 32 : index
    %c0_24 = arith.constant 0 : index
    %31 = vector.load %arg3[%c0_23, %c32, %c0_24] : memref<8x40x128xf32, #tpu.memory_space<vmem>>, vector<1x8x128xf32>
    %32 = vector.shape_cast %31 : vector<1x8x128xf32> to vector<8x128xf32>
    %c0_25 = arith.constant 0 : index
    %c32_26 = arith.constant 32 : index
    %c0_27 = arith.constant 0 : index
    %33 = vector.load %arg2[%c0_25, %c32_26, %c0_27] : memref<1x40x128xf32, #tpu.memory_space<vmem>>, vector<1x8x128xf32>
    %34 = vector.shape_cast %33 : vector<1x8x128xf32> to vector<8x128xf32>
    %35 = arith.mulf %32, %34 : vector<8x128xf32>
    %cst_28 = arith.constant dense<0.000000e+00> : vector<128xf32>
    %36 = vector.multi_reduction <add>, %35, %cst_28 [0] : vector<8x128xf32> to vector<128xf32>
    %37 = vector.shape_cast %36 : vector<128xf32> to vector<1x128xf32>
    %38 = arith.addf %30, %37 : vector<1x128xf32>
    %c0_29 = arith.constant 0 : index
    %c0_30 = arith.constant 0 : index
    %c0_31 = arith.constant 0 : index
    %39 = vector.load %arg4[%c0_29, %c0_30, %c0_31] : memref<1x8x128xf32, #tpu.memory_space<vmem>>, vector<1x1x128xf32>
    %40 = vector.shape_cast %39 : vector<1x1x128xf32> to vector<1x128xf32>
    %41 = vector.shape_cast %38 : vector<1x128xf32> to vector<1x1x128xf32>
    tpu.vector_store %arg4[%c0_29, %c0_30, %c0_31], %41 {strides = array<i32>} : memref<1x8x128xf32, #tpu.memory_space<vmem>>, vector<1x1x128xf32>,
    %c1 = arith.constant 1 : index
    %c0_32 = arith.constant 0 : index
    %c0_33 = arith.constant 0 : index
    %42 = vector.load %arg3[%c1, %c0_32, %c0_33] : memref<8x40x128xf32, #tpu.memory_space<vmem>>, vector<1x8x128xf32>
    %43 = vector.shape_cast %42 : vector<1x8x128xf32> to vector<8x128xf32>
    %c0_34 = arith.constant 0 : index
    %c0_35 = arith.constant 0 : index
    %c0_36 = arith.constant 0 : index
    %44 = vector.load %arg2[%c0_34, %c0_35, %c0_36] : memref<1x40x128xf32, #tpu.memory_space<vmem>>, vector<1x8x128xf32>
    %45 = vector.shape_cast %44 : vector<1x8x128xf32> to vector<8x128xf32>
    %46 = arith.mulf %43, %45 : vector<8x128xf32>
    %cst_37 = arith.constant dense<0.000000e+00> : vector<128xf32>
    %47 = vector.multi_reduction <add>, %46, %cst_37 [0] : vector<8x128xf32> to vector<128xf32>
    %48 = vector.shape_cast %47 : vector<128xf32> to vector<1x128xf32>
    %c1_38 = arith.constant 1 : index
    %c8_39 = arith.constant 8 : index
    %c0_40 = arith.constant 0 : index
    %49 = vector.load %arg3[%c1_38, %c8_39, %c0_40] : memref<8x40x128xf32, #tpu.memory_space<vmem>>, vector<1x8x128xf32>
    %50 = vector.shape_cast %49 : vector<1x8x128xf32> to vector<8x128xf32>
    %c0_41 = arith.constant 0 : index
    %c8_42 = arith.constant 8 : index
    %c0_43 = arith.constant 0 : index
    %51 = vector.load %arg2[%c0_41, %c8_42, %c0_43] : memref<1x40x128xf32, #tpu.memory_space<vmem>>, vector<1x8x128xf32>
    %52 = vector.shape_cast %51 : vector<1x8x128xf32> to vector<8x128xf32>
    %53 = arith.mulf %50, %52 : vector<8x128xf32>
    %cst_44 = arith.constant dense<0.000000e+00> : vector<128xf32>
    %54 = vector.multi_reduction <add>, %53, %cst_44 [0] : vector<8x128xf32> to vector<128xf32>
    %55 = vector.shape_cast %54 : vector<128xf32> to vector<1x128xf32>
    %56 = arith.addf %48, %55 : vector<1x128xf32>
    %c1_45 = arith.constant 1 : index
    %c16_46 = arith.constant 16 : index
    %c0_47 = arith.constant 0 : index
    %57 = vector.load %arg3[%c1_45, %c16_46, %c0_47] : memref<8x40x128xf32, #tpu.memory_space<vmem>>, vector<1x8x128xf32>
    %58 = vector.shape_cast %57 : vector<1x8x128xf32> to vector<8x128xf32>
    %c0_48 = arith.constant 0 : index
    %c16_49 = arith.constant 16 : index
    %c0_50 = arith.constant 0 : index
    %59 = vector.load %arg2[%c0_48, %c16_49, %c0_50] : memref<1x40x128xf32, #tpu.memory_space<vmem>>, vector<1x8x128xf32>
    %60 = vector.shape_cast %59 : vector<1x8x128xf32> to vector<8x128xf32>
    %61 = arith.mulf %58, %60 : vector<8x128xf32>
    %cst_51 = arith.constant dense<0.000000e+00> : vector<128xf32>
    %62 = vector.multi_reduction <add>, %61, %cst_51 [0] : vector<8x128xf32> to vector<128xf32>
    %63 = vector.shape_cast %62 : vector<128xf32> to vector<1x128xf32>
    %64 = arith.addf %56, %63 : vector<1x128xf32>
    %c1_52 = arith.constant 1 : index
    %c24_53 = arith.constant 24 : index
    %c0_54 = arith.constant 0 : index
    %65 = vector.load %arg3[%c1_52, %c24_53, %c0_54] : memref<8x40x128xf32, #tpu.memory_space<vmem>>, vector<1x8x128xf32>
    %66 = vector.shape_cast %65 : vector<1x8x128xf32> to vector<8x128xf32>
    %c0_55 = arith.constant 0 : index
    %c24_56 = arith.constant 24 : index
    %c0_57 = arith.constant 0 : index
    %67 = vector.load %arg2[%c0_55, %c24_56, %c0_57] : memref<1x40x128xf32, #tpu.memory_space<vmem>>, vector<1x8x128xf32>
    %68 = vector.shape_cast %67 : vector<1x8x128xf32> to vector<8x128xf32>
    %69 = arith.mulf %66, %68 : vector<8x128xf32>
    %cst_58 = arith.constant dense<0.000000e+00> : vector<128xf32>
    %70 = vector.multi_reduction <add>, %69, %cst_58 [0] : vector<8x128xf32> to vector<128xf32>
    %71 = vector.shape_cast %70 : vector<128xf32> to vector<1x128xf32>
    %72 = arith.addf %64, %71 : vector<1x128xf32>
    %c1_59 = arith.constant 1 : index
    %c32_60 = arith.constant 32 : index
    %c0_61 = arith.constant 0 : index
    %73 = vector.load %arg3[%c1_59, %c32_60, %c0_61] : memref<8x40x128xf32, #tpu.memory_space<vmem>>, vector<1x8x128xf32>
    %74 = vector.shape_cast %73 : vector<1x8x128xf32> to vector<8x128xf32>
    %c0_62 = arith.constant 0 : index
    %c32_63 = arith.constant 32 : index
    %c0_64 = arith.constant 0 : index
    %75 = vector.load %arg2[%c0_62, %c32_63, %c0_64] : memref<1x40x128xf32, #tpu.memory_space<vmem>>, vector<1x8x128xf32>
    %76 = vector.shape_cast %75 : vector<1x8x128xf32> to vector<8x128xf32>
    %77 = arith.mulf %74, %76 : vector<8x128xf32>
    %cst_65 = arith.constant dense<0.000000e+00> : vector<128xf32>
    %78 = vector.multi_reduction <add>, %77, %cst_65 [0] : vector<8x128xf32> to vector<128xf32>
    %79 = vector.shape_cast %78 : vector<128xf32> to vector<1x128xf32>
    %80 = arith.addf %72, %79 : vector<1x128xf32>
    %c0_66 = arith.constant 0 : index
    %c1_67 = arith.constant 1 : index
    %c0_68 = arith.constant 0 : index
    %81 = vector.load %arg4[%c0_66, %c1_67, %c0_68] : memref<1x8x128xf32, #tpu.memory_space<vmem>>, vector<1x1x128xf32>
    %82 = vector.shape_cast %81 : vector<1x1x128xf32> to vector<1x128xf32>
    %83 = vector.shape_cast %80 : vector<1x128xf32> to vector<1x1x128xf32>
    tpu.vector_store %arg4[%c0_66, %c1_67, %c0_68], %83 {strides = array<i32>} : memref<1x8x128xf32, #tpu.memory_space<vmem>>, vector<1x1x128xf32>,
    %c2 = arith.constant 2 : index
    %c0_69 = arith.constant 0 : index
    %c0_70 = arith.constant 0 : index
    %84 = vector.load %arg3[%c2, %c0_69, %c0_70] : memref<8x40x128xf32, #tpu.memory_space<vmem>>, vector<1x8x128xf32>
    %85 = vector.shape_cast %84 : vector<1x8x128xf32> to vector<8x128xf32>
    %c0_71 = arith.constant 0 : index
    %c0_72 = arith.constant 0 : index
    %c0_73 = arith.constant 0 : index
    %86 = vector.load %arg2[%c0_71, %c0_72, %c0_73] : memref<1x40x128xf32, #tpu.memory_space<vmem>>, vector<1x8x128xf32>
    %87 = vector.shape_cast %86 : vector<1x8x128xf32> to vector<8x128xf32>
    %88 = arith.mulf %85, %87 : vector<8x128xf32>
    %cst_74 = arith.constant dense<0.000000e+00> : vector<128xf32>
    %89 = vector.multi_reduction <add>, %88, %cst_74 [0] : vector<8x128xf32> to vector<128xf32>
    %90 = vector.shape_cast %89 : vector<128xf32> to vector<1x128xf32>
    %c2_75 = arith.constant 2 : index
    %c8_76 = arith.constant 8 : index
    %c0_77 = arith.constant 0 : index
    %91 = vector.load %arg3[%c2_75, %c8_76, %c0_77] : memref<8x40x128xf32, #tpu.memory_space<vmem>>, vector<1x8x128xf32>
    %92 = vector.shape_cast %91 : vector<1x8x128xf32> to vector<8x128xf32>
    %c0_78 = arith.constant 0 : index
    %c8_79 = arith.constant 8 : index
    %c0_80 = arith.constant 0 : index
    %93 = vector.load %arg2[%c0_78, %c8_79, %c0_80] : memref<1x40x128xf32, #tpu.memory_space<vmem>>, vector<1x8x128xf32>
    %94 = vector.shape_cast %93 : vector<1x8x128xf32> to vector<8x128xf32>
    %95 = arith.mulf %92, %94 : vector<8x128xf32>
    %cst_81 = arith.constant dense<0.000000e+00> : vector<128xf32>
    %96 = vector.multi_reduction <add>, %95, %cst_81 [0] : vector<8x128xf32> to vector<128xf32>
    %97 = vector.shape_cast %96 : vector<128xf32> to vector<1x128xf32>
    %98 = arith.addf %90, %97 : vector<1x128xf32>
    %c2_82 = arith.constant 2 : index
    %c16_83 = arith.constant 16 : index
    %c0_84 = arith.constant 0 : index
    %99 = vector.load %arg3[%c2_82, %c16_83, %c0_84] : memref<8x40x128xf32, #tpu.memory_space<vmem>>, vector<1x8x128xf32>
    %100 = vector.shape_cast %99 : vector<1x8x128xf32> to vector<8x128xf32>
    %c0_85 = arith.constant 0 : index
    %c16_86 = arith.constant 16 : index
    %c0_87 = arith.constant 0 : index
    %101 = vector.load %arg2[%c0_85, %c16_86, %c0_87] : memref<1x40x128xf32, #tpu.memory_space<vmem>>, vector<1x8x128xf32>
    %102 = vector.shape_cast %101 : vector<1x8x128xf32> to vector<8x128xf32>
    %103 = arith.mulf %100, %102 : vector<8x128xf32>
    %cst_88 = arith.constant dense<0.000000e+00> : vector<128xf32>
    %104 = vector.multi_reduction <add>, %103, %cst_88 [0] : vector<8x128xf32> to vector<128xf32>
    %105 = vector.shape_cast %104 : vector<128xf32> to vector<1x128xf32>
    %106 = arith.addf %98, %105 : vector<1x128xf32>
    %c2_89 = arith.constant 2 : index
    %c24_90 = arith.constant 24 : index
    %c0_91 = arith.constant 0 : index
    %107 = vector.load %arg3[%c2_89, %c24_90, %c0_91] : memref<8x40x128xf32, #tpu.memory_space<vmem>>, vector<1x8x128xf32>
    %108 = vector.shape_cast %107 : vector<1x8x128xf32> to vector<8x128xf32>
    %c0_92 = arith.constant 0 : index
    %c24_93 = arith.constant 24 : index
    %c0_94 = arith.constant 0 : index
    %109 = vector.load %arg2[%c0_92, %c24_93, %c0_94] : memref<1x40x128xf32, #tpu.memory_space<vmem>>, vector<1x8x128xf32>
    %110 = vector.shape_cast %109 : vector<1x8x128xf32> to vector<8x128xf32>
    %111 = arith.mulf %108, %110 : vector<8x128xf32>
    %cst_95 = arith.constant dense<0.000000e+00> : vector<128xf32>
    %112 = vector.multi_reduction <add>, %111, %cst_95 [0] : vector<8x128xf32> to vector<128xf32>
    %113 = vector.shape_cast %112 : vector<128xf32> to vector<1x128xf32>
    %114 = arith.addf %106, %113 : vector<1x128xf32>
    %c2_96 = arith.constant 2 : index
    %c32_97 = arith.constant 32 : index
    %c0_98 = arith.constant 0 : index
    %115 = vector.load %arg3[%c2_96, %c32_97, %c0_98] : memref<8x40x128xf32, #tpu.memory_space<vmem>>, vector<1x8x128xf32>
    %116 = vector.shape_cast %115 : vector<1x8x128xf32> to vector<8x128xf32>
    %c0_99 = arith.constant 0 : index
    %c32_100 = arith.constant 32 : index
    %c0_101 = arith.constant 0 : index
    %117 = vector.load %arg2[%c0_99, %c32_100, %c0_101] : memref<1x40x128xf32, #tpu.memory_space<vmem>>, vector<1x8x128xf32>
    %118 = vector.shape_cast %117 : vector<1x8x128xf32> to vector<8x128xf32>
    %119 = arith.mulf %116, %118 : vector<8x128xf32>
    %cst_102 = arith.constant dense<0.000000e+00> : vector<128xf32>
    %120 = vector.multi_reduction <add>, %119, %cst_102 [0] : vector<8x128xf32> to vector<128xf32>
    %121 = vector.shape_cast %120 : vector<128xf32> to vector<1x128xf32>
    %122 = arith.addf %114, %121 : vector<1x128xf32>
    %c0_103 = arith.constant 0 : index
    %c2_104 = arith.constant 2 : index
    %c0_105 = arith.constant 0 : index
    %123 = vector.load %arg4[%c0_103, %c2_104, %c0_105] : memref<1x8x128xf32, #tpu.memory_space<vmem>>, vector<1x1x128xf32>
    %124 = vector.shape_cast %123 : vector<1x1x128xf32> to vector<1x128xf32>
    %125 = vector.shape_cast %122 : vector<1x128xf32> to vector<1x1x128xf32>
    tpu.vector_store %arg4[%c0_103, %c2_104, %c0_105], %125 {strides = array<i32>} : memref<1x8x128xf32, #tpu.memory_space<vmem>>, vector<1x1x128xf32>,
    %c3 = arith.constant 3 : index
    %c0_106 = arith.constant 0 : index
    %c0_107 = arith.constant 0 : index
    %126 = vector.load %arg3[%c3, %c0_106, %c0_107] : memref<8x40x128xf32, #tpu.memory_space<vmem>>, vector<1x8x128xf32>
    %127 = vector.shape_cast %126 : vector<1x8x128xf32> to vector<8x128xf32>
    %c0_108 = arith.constant 0 : index
    %c0_109 = arith.constant 0 : index
    %c0_110 = arith.constant 0 : index
    %128 = vector.load %arg2[%c0_108, %c0_109, %c0_110] : memref<1x40x128xf32, #tpu.memory_space<vmem>>, vector<1x8x128xf32>
    %129 = vector.shape_cast %128 : vector<1x8x128xf32> to vector<8x128xf32>
    %130 = arith.mulf %127, %129 : vector<8x128xf32>
    %cst_111 = arith.constant dense<0.000000e+00> : vector<128xf32>
    %131 = vector.multi_reduction <add>, %130, %cst_111 [0] : vector<8x128xf32> to vector<128xf32>
    %132 = vector.shape_cast %131 : vector<128xf32> to vector<1x128xf32>
    %c3_112 = arith.constant 3 : index
    %c8_113 = arith.constant 8 : index
    %c0_114 = arith.constant 0 : index
    %133 = vector.load %arg3[%c3_112, %c8_113, %c0_114] : memref<8x40x128xf32, #tpu.memory_space<vmem>>, vector<1x8x128xf32>
    %134 = vector.shape_cast %133 : vector<1x8x128xf32> to vector<8x128xf32>
    %c0_115 = arith.constant 0 : index
    %c8_116 = arith.constant 8 : index
    %c0_117 = arith.constant 0 : index
    %135 = vector.load %arg2[%c0_115, %c8_116, %c0_117] : memref<1x40x128xf32, #tpu.memory_space<vmem>>, vector<1x8x128xf32>
    %136 = vector.shape_cast %135 : vector<1x8x128xf32> to vector<8x128xf32>
    %137 = arith.mulf %134, %136 : vector<8x128xf32>
    %cst_118 = arith.constant dense<0.000000e+00> : vector<128xf32>
    %138 = vector.multi_reduction <add>, %137, %cst_118 [0] : vector<8x128xf32> to vector<128xf32>
    %139 = vector.shape_cast %138 : vector<128xf32> to vector<1x128xf32>
    %140 = arith.addf %132, %139 : vector<1x128xf32>
    %c3_119 = arith.constant 3 : index
    %c16_120 = arith.constant 16 : index
    %c0_121 = arith.constant 0 : index
    %141 = vector.load %arg3[%c3_119, %c16_120, %c0_121] : memref<8x40x128xf32, #tpu.memory_space<vmem>>, vector<1x8x128xf32>
    %142 = vector.shape_cast %141 : vector<1x8x128xf32> to vector<8x128xf32>
    %c0_122 = arith.constant 0 : index
    %c16_123 = arith.constant 16 : index
    %c0_124 = arith.constant 0 : index
    %143 = vector.load %arg2[%c0_122, %c16_123, %c0_124] : memref<1x40x128xf32, #tpu.memory_space<vmem>>, vector<1x8x128xf32>
    %144 = vector.shape_cast %143 : vector<1x8x128xf32> to vector<8x128xf32>
    %145 = arith.mulf %142, %144 : vector<8x128xf32>
    %cst_125 = arith.constant dense<0.000000e+00> : vector<128xf32>
    %146 = vector.multi_reduction <add>, %145, %cst_125 [0] : vector<8x128xf32> to vector<128xf32>
    %147 = vector.shape_cast %146 : vector<128xf32> to vector<1x128xf32>
    %148 = arith.addf %140, %147 : vector<1x128xf32>
    %c3_126 = arith.constant 3 : index
    %c24_127 = arith.constant 24 : index
    %c0_128 = arith.constant 0 : index
    %149 = vector.load %arg3[%c3_126, %c24_127, %c0_128] : memref<8x40x128xf32, #tpu.memory_space<vmem>>, vector<1x8x128xf32>
    %150 = vector.shape_cast %149 : vector<1x8x128xf32> to vector<8x128xf32>
    %c0_129 = arith.constant 0 : index
    %c24_130 = arith.constant 24 : index
    %c0_131 = arith.constant 0 : index
    %151 = vector.load %arg2[%c0_129, %c24_130, %c0_131] : memref<1x40x128xf32, #tpu.memory_space<vmem>>, vector<1x8x128xf32>
    %152 = vector.shape_cast %151 : vector<1x8x128xf32> to vector<8x128xf32>
    %153 = arith.mulf %150, %152 : vector<8x128xf32>
    %cst_132 = arith.constant dense<0.000000e+00> : vector<128xf32>
    %154 = vector.multi_reduction <add>, %153, %cst_132 [0] : vector<8x128xf32> to vector<128xf32>
    %155 = vector.shape_cast %154 : vector<128xf32> to vector<1x128xf32>
    %156 = arith.addf %148, %155 : vector<1x128xf32>
    %c3_133 = arith.constant 3 : index
    %c32_134 = arith.constant 32 : index
    %c0_135 = arith.constant 0 : index
    %157 = vector.load %arg3[%c3_133, %c32_134, %c0_135] : memref<8x40x128xf32, #tpu.memory_space<vmem>>, vector<1x8x128xf32>
    %158 = vector.shape_cast %157 : vector<1x8x128xf32> to vector<8x128xf32>
    %c0_136 = arith.constant 0 : index
    %c32_137 = arith.constant 32 : index
    %c0_138 = arith.constant 0 : index
    %159 = vector.load %arg2[%c0_136, %c32_137, %c0_138] : memref<1x40x128xf32, #tpu.memory_space<vmem>>, vector<1x8x128xf32>
    %160 = vector.shape_cast %159 : vector<1x8x128xf32> to vector<8x128xf32>
    %161 = arith.mulf %158, %160 : vector<8x128xf32>
    %cst_139 = arith.constant dense<0.000000e+00> : vector<128xf32>
    %162 = vector.multi_reduction <add>, %161, %cst_139 [0] : vector<8x128xf32> to vector<128xf32>
    %163 = vector.shape_cast %162 : vector<128xf32> to vector<1x128xf32>
    %164 = arith.addf %156, %163 : vector<1x128xf32>
    %c0_140 = arith.constant 0 : index
    %c3_141 = arith.constant 3 : index
    %c0_142 = arith.constant 0 : index
    %165 = vector.load %arg4[%c0_140, %c3_141, %c0_142] : memref<1x8x128xf32, #tpu.memory_space<vmem>>, vector<1x1x128xf32>
    %166 = vector.shape_cast %165 : vector<1x1x128xf32> to vector<1x128xf32>
    %167 = vector.shape_cast %164 : vector<1x128xf32> to vector<1x1x128xf32>
    tpu.vector_store %arg4[%c0_140, %c3_141, %c0_142], %167 {strides = array<i32>} : memref<1x8x128xf32, #tpu.memory_space<vmem>>, vector<1x1x128xf32>,
    %c4 = arith.constant 4 : index
    %c0_143 = arith.constant 0 : index
    %c0_144 = arith.constant 0 : index
    %168 = vector.load %arg3[%c4, %c0_143, %c0_144] : memref<8x40x128xf32, #tpu.memory_space<vmem>>, vector<1x8x128xf32>
    %169 = vector.shape_cast %168 : vector<1x8x128xf32> to vector<8x128xf32>
    %c0_145 = arith.constant 0 : index
    %c0_146 = arith.constant 0 : index
    %c0_147 = arith.constant 0 : index
    %170 = vector.load %arg2[%c0_145, %c0_146, %c0_147] : memref<1x40x128xf32, #tpu.memory_space<vmem>>, vector<1x8x128xf32>
    %171 = vector.shape_cast %170 : vector<1x8x128xf32> to vector<8x128xf32>
    %172 = arith.mulf %169, %171 : vector<8x128xf32>
    %cst_148 = arith.constant dense<0.000000e+00> : vector<128xf32>
    %173 = vector.multi_reduction <add>, %172, %cst_148 [0] : vector<8x128xf32> to vector<128xf32>
    %174 = vector.shape_cast %173 : vector<128xf32> to vector<1x128xf32>
    %c4_149 = arith.constant 4 : index
    %c8_150 = arith.constant 8 : index
    %c0_151 = arith.constant 0 : index
    %175 = vector.load %arg3[%c4_149, %c8_150, %c0_151] : memref<8x40x128xf32, #tpu.memory_space<vmem>>, vector<1x8x128xf32>
    %176 = vector.shape_cast %175 : vector<1x8x128xf32> to vector<8x128xf32>
    %c0_152 = arith.constant 0 : index
    %c8_153 = arith.constant 8 : index
    %c0_154 = arith.constant 0 : index
    %177 = vector.load %arg2[%c0_152, %c8_153, %c0_154] : memref<1x40x128xf32, #tpu.memory_space<vmem>>, vector<1x8x128xf32>
    %178 = vector.shape_cast %177 : vector<1x8x128xf32> to vector<8x128xf32>
    %179 = arith.mulf %176, %178 : vector<8x128xf32>
    %cst_155 = arith.constant dense<0.000000e+00> : vector<128xf32>
    %180 = vector.multi_reduction <add>, %179, %cst_155 [0] : vector<8x128xf32> to vector<128xf32>
    %181 = vector.shape_cast %180 : vector<128xf32> to vector<1x128xf32>
    %182 = arith.addf %174, %181 : vector<1x128xf32>
    %c4_156 = arith.constant 4 : index
    %c16_157 = arith.constant 16 : index
    %c0_158 = arith.constant 0 : index
    %183 = vector.load %arg3[%c4_156, %c16_157, %c0_158] : memref<8x40x128xf32, #tpu.memory_space<vmem>>, vector<1x8x128xf32>
    %184 = vector.shape_cast %183 : vector<1x8x128xf32> to vector<8x128xf32>
    %c0_159 = arith.constant 0 : index
    %c16_160 = arith.constant 16 : index
    %c0_161 = arith.constant 0 : index
    %185 = vector.load %arg2[%c0_159, %c16_160, %c0_161] : memref<1x40x128xf32, #tpu.memory_space<vmem>>, vector<1x8x128xf32>
    %186 = vector.shape_cast %185 : vector<1x8x128xf32> to vector<8x128xf32>
    %187 = arith.mulf %184, %186 : vector<8x128xf32>
    %cst_162 = arith.constant dense<0.000000e+00> : vector<128xf32>
    %188 = vector.multi_reduction <add>, %187, %cst_162 [0] : vector<8x128xf32> to vector<128xf32>
    %189 = vector.shape_cast %188 : vector<128xf32> to vector<1x128xf32>
    %190 = arith.addf %182, %189 : vector<1x128xf32>
    %c4_163 = arith.constant 4 : index
    %c24_164 = arith.constant 24 : index
    %c0_165 = arith.constant 0 : index
    %191 = vector.load %arg3[%c4_163, %c24_164, %c0_165] : memref<8x40x128xf32, #tpu.memory_space<vmem>>, vector<1x8x128xf32>
    %192 = vector.shape_cast %191 : vector<1x8x128xf32> to vector<8x128xf32>
    %c0_166 = arith.constant 0 : index
    %c24_167 = arith.constant 24 : index
    %c0_168 = arith.constant 0 : index
    %193 = vector.load %arg2[%c0_166, %c24_167, %c0_168] : memref<1x40x128xf32, #tpu.memory_space<vmem>>, vector<1x8x128xf32>
    %194 = vector.shape_cast %193 : vector<1x8x128xf32> to vector<8x128xf32>
    %195 = arith.mulf %192, %194 : vector<8x128xf32>
    %cst_169 = arith.constant dense<0.000000e+00> : vector<128xf32>
    %196 = vector.multi_reduction <add>, %195, %cst_169 [0] : vector<8x128xf32> to vector<128xf32>
    %197 = vector.shape_cast %196 : vector<128xf32> to vector<1x128xf32>
    %198 = arith.addf %190, %197 : vector<1x128xf32>
    %c4_170 = arith.constant 4 : index
    %c32_171 = arith.constant 32 : index
    %c0_172 = arith.constant 0 : index
    %199 = vector.load %arg3[%c4_170, %c32_171, %c0_172] : memref<8x40x128xf32, #tpu.memory_space<vmem>>, vector<1x8x128xf32>
    %200 = vector.shape_cast %199 : vector<1x8x128xf32> to vector<8x128xf32>
    %c0_173 = arith.constant 0 : index
    %c32_174 = arith.constant 32 : index
    %c0_175 = arith.constant 0 : index
    %201 = vector.load %arg2[%c0_173, %c32_174, %c0_175] : memref<1x40x128xf32, #tpu.memory_space<vmem>>, vector<1x8x128xf32>
    %202 = vector.shape_cast %201 : vector<1x8x128xf32> to vector<8x128xf32>
    %203 = arith.mulf %200, %202 : vector<8x128xf32>
    %cst_176 = arith.constant dense<0.000000e+00> : vector<128xf32>
    %204 = vector.multi_reduction <add>, %203, %cst_176 [0] : vector<8x128xf32> to vector<128xf32>
    %205 = vector.shape_cast %204 : vector<128xf32> to vector<1x128xf32>
    %206 = arith.addf %198, %205 : vector<1x128xf32>
    %c0_177 = arith.constant 0 : index
    %c4_178 = arith.constant 4 : index
    %c0_179 = arith.constant 0 : index
    %207 = vector.load %arg4[%c0_177, %c4_178, %c0_179] : memref<1x8x128xf32, #tpu.memory_space<vmem>>, vector<1x1x128xf32>
    %208 = vector.shape_cast %207 : vector<1x1x128xf32> to vector<1x128xf32>
    %209 = vector.shape_cast %206 : vector<1x128xf32> to vector<1x1x128xf32>
    tpu.vector_store %arg4[%c0_177, %c4_178, %c0_179], %209 {strides = array<i32>} : memref<1x8x128xf32, #tpu.memory_space<vmem>>, vector<1x1x128xf32>,
    %c5 = arith.constant 5 : index
    %c0_180 = arith.constant 0 : index
    %c0_181 = arith.constant 0 : index
    %210 = vector.load %arg3[%c5, %c0_180, %c0_181] : memref<8x40x128xf32, #tpu.memory_space<vmem>>, vector<1x8x128xf32>
    %211 = vector.shape_cast %210 : vector<1x8x128xf32> to vector<8x128xf32>
    %c0_182 = arith.constant 0 : index
    %c0_183 = arith.constant 0 : index
    %c0_184 = arith.constant 0 : index
    %212 = vector.load %arg2[%c0_182, %c0_183, %c0_184] : memref<1x40x128xf32, #tpu.memory_space<vmem>>, vector<1x8x128xf32>
    %213 = vector.shape_cast %212 : vector<1x8x128xf32> to vector<8x128xf32>
    %214 = arith.mulf %211, %213 : vector<8x128xf32>
    %cst_185 = arith.constant dense<0.000000e+00> : vector<128xf32>
    %215 = vector.multi_reduction <add>, %214, %cst_185 [0] : vector<8x128xf32> to vector<128xf32>
    %216 = vector.shape_cast %215 : vector<128xf32> to vector<1x128xf32>
    %c5_186 = arith.constant 5 : index
    %c8_187 = arith.constant 8 : index
    %c0_188 = arith.constant 0 : index
    %217 = vector.load %arg3[%c5_186, %c8_187, %c0_188] : memref<8x40x128xf32, #tpu.memory_space<vmem>>, vector<1x8x128xf32>
    %218 = vector.shape_cast %217 : vector<1x8x128xf32> to vector<8x128xf32>
    %c0_189 = arith.constant 0 : index
    %c8_190 = arith.constant 8 : index
    %c0_191 = arith.constant 0 : index
    %219 = vector.load %arg2[%c0_189, %c8_190, %c0_191] : memref<1x40x128xf32, #tpu.memory_space<vmem>>, vector<1x8x128xf32>
    %220 = vector.shape_cast %219 : vector<1x8x128xf32> to vector<8x128xf32>
    %221 = arith.mulf %218, %220 : vector<8x128xf32>
    %cst_192 = arith.constant dense<0.000000e+00> : vector<128xf32>
    %222 = vector.multi_reduction <add>, %221, %cst_192 [0] : vector<8x128xf32> to vector<128xf32>
    %223 = vector.shape_cast %222 : vector<128xf32> to vector<1x128xf32>
    %224 = arith.addf %216, %223 : vector<1x128xf32>
    %c5_193 = arith.constant 5 : index
    %c16_194 = arith.constant 16 : index
    %c0_195 = arith.constant 0 : index
    %225 = vector.load %arg3[%c5_193, %c16_194, %c0_195] : memref<8x40x128xf32, #tpu.memory_space<vmem>>, vector<1x8x128xf32>
    %226 = vector.shape_cast %225 : vector<1x8x128xf32> to vector<8x128xf32>
    %c0_196 = arith.constant 0 : index
    %c16_197 = arith.constant 16 : index
    %c0_198 = arith.constant 0 : index
    %227 = vector.load %arg2[%c0_196, %c16_197, %c0_198] : memref<1x40x128xf32, #tpu.memory_space<vmem>>, vector<1x8x128xf32>
    %228 = vector.shape_cast %227 : vector<1x8x128xf32> to vector<8x128xf32>
    %229 = arith.mulf %226, %228 : vector<8x128xf32>
    %cst_199 = arith.constant dense<0.000000e+00> : vector<128xf32>
    %230 = vector.multi_reduction <add>, %229, %cst_199 [0] : vector<8x128xf32> to vector<128xf32>
    %231 = vector.shape_cast %230 : vector<128xf32> to vector<1x128xf32>
    %232 = arith.addf %224, %231 : vector<1x128xf32>
    %c5_200 = arith.constant 5 : index
    %c24_201 = arith.constant 24 : index
    %c0_202 = arith.constant 0 : index
    %233 = vector.load %arg3[%c5_200, %c24_201, %c0_202] : memref<8x40x128xf32, #tpu.memory_space<vmem>>, vector<1x8x128xf32>
    %234 = vector.shape_cast %233 : vector<1x8x128xf32> to vector<8x128xf32>
    %c0_203 = arith.constant 0 : index
    %c24_204 = arith.constant 24 : index
    %c0_205 = arith.constant 0 : index
    %235 = vector.load %arg2[%c0_203, %c24_204, %c0_205] : memref<1x40x128xf32, #tpu.memory_space<vmem>>, vector<1x8x128xf32>
    %236 = vector.shape_cast %235 : vector<1x8x128xf32> to vector<8x128xf32>
    %237 = arith.mulf %234, %236 : vector<8x128xf32>
    %cst_206 = arith.constant dense<0.000000e+00> : vector<128xf32>
    %238 = vector.multi_reduction <add>, %237, %cst_206 [0] : vector<8x128xf32> to vector<128xf32>
    %239 = vector.shape_cast %238 : vector<128xf32> to vector<1x128xf32>
    %240 = arith.addf %232, %239 : vector<1x128xf32>
    %c5_207 = arith.constant 5 : index
    %c32_208 = arith.constant 32 : index
    %c0_209 = arith.constant 0 : index
    %241 = vector.load %arg3[%c5_207, %c32_208, %c0_209] : memref<8x40x128xf32, #tpu.memory_space<vmem>>, vector<1x8x128xf32>
    %242 = vector.shape_cast %241 : vector<1x8x128xf32> to vector<8x128xf32>
    %c0_210 = arith.constant 0 : index
    %c32_211 = arith.constant 32 : index
    %c0_212 = arith.constant 0 : index
    %243 = vector.load %arg2[%c0_210, %c32_211, %c0_212] : memref<1x40x128xf32, #tpu.memory_space<vmem>>, vector<1x8x128xf32>
    %244 = vector.shape_cast %243 : vector<1x8x128xf32> to vector<8x128xf32>
    %245 = arith.mulf %242, %244 : vector<8x128xf32>
    %cst_213 = arith.constant dense<0.000000e+00> : vector<128xf32>
    %246 = vector.multi_reduction <add>, %245, %cst_213 [0] : vector<8x128xf32> to vector<128xf32>
    %247 = vector.shape_cast %246 : vector<128xf32> to vector<1x128xf32>
    %248 = arith.addf %240, %247 : vector<1x128xf32>
    %c0_214 = arith.constant 0 : index
    %c5_215 = arith.constant 5 : index
    %c0_216 = arith.constant 0 : index
    %249 = vector.load %arg4[%c0_214, %c5_215, %c0_216] : memref<1x8x128xf32, #tpu.memory_space<vmem>>, vector<1x1x128xf32>
    %250 = vector.shape_cast %249 : vector<1x1x128xf32> to vector<1x128xf32>
    %251 = vector.shape_cast %248 : vector<1x128xf32> to vector<1x1x128xf32>
    tpu.vector_store %arg4[%c0_214, %c5_215, %c0_216], %251 {strides = array<i32>} : memref<1x8x128xf32, #tpu.memory_space<vmem>>, vector<1x1x128xf32>,
    %c6 = arith.constant 6 : index
    %c0_217 = arith.constant 0 : index
    %c0_218 = arith.constant 0 : index
    %252 = vector.load %arg3[%c6, %c0_217, %c0_218] : memref<8x40x128xf32, #tpu.memory_space<vmem>>, vector<1x8x128xf32>
    %253 = vector.shape_cast %252 : vector<1x8x128xf32> to vector<8x128xf32>
    %c0_219 = arith.constant 0 : index
    %c0_220 = arith.constant 0 : index
    %c0_221 = arith.constant 0 : index
    %254 = vector.load %arg2[%c0_219, %c0_220, %c0_221] : memref<1x40x128xf32, #tpu.memory_space<vmem>>, vector<1x8x128xf32>
    %255 = vector.shape_cast %254 : vector<1x8x128xf32> to vector<8x128xf32>
    %256 = arith.mulf %253, %255 : vector<8x128xf32>
    %cst_222 = arith.constant dense<0.000000e+00> : vector<128xf32>
    %257 = vector.multi_reduction <add>, %256, %cst_222 [0] : vector<8x128xf32> to vector<128xf32>
    %258 = vector.shape_cast %257 : vector<128xf32> to vector<1x128xf32>
    %c6_223 = arith.constant 6 : index
    %c8_224 = arith.constant 8 : index
    %c0_225 = arith.constant 0 : index
    %259 = vector.load %arg3[%c6_223, %c8_224, %c0_225] : memref<8x40x128xf32, #tpu.memory_space<vmem>>, vector<1x8x128xf32>
    %260 = vector.shape_cast %259 : vector<1x8x128xf32> to vector<8x128xf32>
    %c0_226 = arith.constant 0 : index
    %c8_227 = arith.constant 8 : index
    %c0_228 = arith.constant 0 : index
    %261 = vector.load %arg2[%c0_226, %c8_227, %c0_228] : memref<1x40x128xf32, #tpu.memory_space<vmem>>, vector<1x8x128xf32>
    %262 = vector.shape_cast %261 : vector<1x8x128xf32> to vector<8x128xf32>
    %263 = arith.mulf %260, %262 : vector<8x128xf32>
    %cst_229 = arith.constant dense<0.000000e+00> : vector<128xf32>
    %264 = vector.multi_reduction <add>, %263, %cst_229 [0] : vector<8x128xf32> to vector<128xf32>
    %265 = vector.shape_cast %264 : vector<128xf32> to vector<1x128xf32>
    %266 = arith.addf %258, %265 : vector<1x128xf32>
    %c6_230 = arith.constant 6 : index
    %c16_231 = arith.constant 16 : index
    %c0_232 = arith.constant 0 : index
    %267 = vector.load %arg3[%c6_230, %c16_231, %c0_232] : memref<8x40x128xf32, #tpu.memory_space<vmem>>, vector<1x8x128xf32>
    %268 = vector.shape_cast %267 : vector<1x8x128xf32> to vector<8x128xf32>
    %c0_233 = arith.constant 0 : index
    %c16_234 = arith.constant 16 : index
    %c0_235 = arith.constant 0 : index
    %269 = vector.load %arg2[%c0_233, %c16_234, %c0_235] : memref<1x40x128xf32, #tpu.memory_space<vmem>>, vector<1x8x128xf32>
    %270 = vector.shape_cast %269 : vector<1x8x128xf32> to vector<8x128xf32>
    %271 = arith.mulf %268, %270 : vector<8x128xf32>
    %cst_236 = arith.constant dense<0.000000e+00> : vector<128xf32>
    %272 = vector.multi_reduction <add>, %271, %cst_236 [0] : vector<8x128xf32> to vector<128xf32>
    %273 = vector.shape_cast %272 : vector<128xf32> to vector<1x128xf32>
    %274 = arith.addf %266, %273 : vector<1x128xf32>
    %c6_237 = arith.constant 6 : index
    %c24_238 = arith.constant 24 : index
    %c0_239 = arith.constant 0 : index
    %275 = vector.load %arg3[%c6_237, %c24_238, %c0_239] : memref<8x40x128xf32, #tpu.memory_space<vmem>>, vector<1x8x128xf32>
    %276 = vector.shape_cast %275 : vector<1x8x128xf32> to vector<8x128xf32>
    %c0_240 = arith.constant 0 : index
    %c24_241 = arith.constant 24 : index
    %c0_242 = arith.constant 0 : index
    %277 = vector.load %arg2[%c0_240, %c24_241, %c0_242] : memref<1x40x128xf32, #tpu.memory_space<vmem>>, vector<1x8x128xf32>
    %278 = vector.shape_cast %277 : vector<1x8x128xf32> to vector<8x128xf32>
    %279 = arith.mulf %276, %278 : vector<8x128xf32>
    %cst_243 = arith.constant dense<0.000000e+00> : vector<128xf32>
    %280 = vector.multi_reduction <add>, %279, %cst_243 [0] : vector<8x128xf32> to vector<128xf32>
    %281 = vector.shape_cast %280 : vector<128xf32> to vector<1x128xf32>
    %282 = arith.addf %274, %281 : vector<1x128xf32>
    %c6_244 = arith.constant 6 : index
    %c32_245 = arith.constant 32 : index
    %c0_246 = arith.constant 0 : index
    %283 = vector.load %arg3[%c6_244, %c32_245, %c0_246] : memref<8x40x128xf32, #tpu.memory_space<vmem>>, vector<1x8x128xf32>
    %284 = vector.shape_cast %283 : vector<1x8x128xf32> to vector<8x128xf32>
    %c0_247 = arith.constant 0 : index
    %c32_248 = arith.constant 32 : index
    %c0_249 = arith.constant 0 : index
    %285 = vector.load %arg2[%c0_247, %c32_248, %c0_249] : memref<1x40x128xf32, #tpu.memory_space<vmem>>, vector<1x8x128xf32>
    %286 = vector.shape_cast %285 : vector<1x8x128xf32> to vector<8x128xf32>
    %287 = arith.mulf %284, %286 : vector<8x128xf32>
    %cst_250 = arith.constant dense<0.000000e+00> : vector<128xf32>
    %288 = vector.multi_reduction <add>, %287, %cst_250 [0] : vector<8x128xf32> to vector<128xf32>
    %289 = vector.shape_cast %288 : vector<128xf32> to vector<1x128xf32>
    %290 = arith.addf %282, %289 : vector<1x128xf32>
    %c0_251 = arith.constant 0 : index
    %c6_252 = arith.constant 6 : index
    %c0_253 = arith.constant 0 : index
    %291 = vector.load %arg4[%c0_251, %c6_252, %c0_253] : memref<1x8x128xf32, #tpu.memory_space<vmem>>, vector<1x1x128xf32>
    %292 = vector.shape_cast %291 : vector<1x1x128xf32> to vector<1x128xf32>
    %293 = vector.shape_cast %290 : vector<1x128xf32> to vector<1x1x128xf32>
    tpu.vector_store %arg4[%c0_251, %c6_252, %c0_253], %293 {strides = array<i32>} : memref<1x8x128xf32, #tpu.memory_space<vmem>>, vector<1x1x128xf32>,
    %c7 = arith.constant 7 : index
    %c0_254 = arith.constant 0 : index
    %c0_255 = arith.constant 0 : index
    %294 = vector.load %arg3[%c7, %c0_254, %c0_255] : memref<8x40x128xf32, #tpu.memory_space<vmem>>, vector<1x8x128xf32>
    %295 = vector.shape_cast %294 : vector<1x8x128xf32> to vector<8x128xf32>
    %c0_256 = arith.constant 0 : index
    %c0_257 = arith.constant 0 : index
    %c0_258 = arith.constant 0 : index
    %296 = vector.load %arg2[%c0_256, %c0_257, %c0_258] : memref<1x40x128xf32, #tpu.memory_space<vmem>>, vector<1x8x128xf32>
    %297 = vector.shape_cast %296 : vector<1x8x128xf32> to vector<8x128xf32>
    %298 = arith.mulf %295, %297 : vector<8x128xf32>
    %cst_259 = arith.constant dense<0.000000e+00> : vector<128xf32>
    %299 = vector.multi_reduction <add>, %298, %cst_259 [0] : vector<8x128xf32> to vector<128xf32>
    %300 = vector.shape_cast %299 : vector<128xf32> to vector<1x128xf32>
    %c7_260 = arith.constant 7 : index
    %c8_261 = arith.constant 8 : index
    %c0_262 = arith.constant 0 : index
    %301 = vector.load %arg3[%c7_260, %c8_261, %c0_262] : memref<8x40x128xf32, #tpu.memory_space<vmem>>, vector<1x8x128xf32>
    %302 = vector.shape_cast %301 : vector<1x8x128xf32> to vector<8x128xf32>
    %c0_263 = arith.constant 0 : index
    %c8_264 = arith.constant 8 : index
    %c0_265 = arith.constant 0 : index
    %303 = vector.load %arg2[%c0_263, %c8_264, %c0_265] : memref<1x40x128xf32, #tpu.memory_space<vmem>>, vector<1x8x128xf32>
    %304 = vector.shape_cast %303 : vector<1x8x128xf32> to vector<8x128xf32>
    %305 = arith.mulf %302, %304 : vector<8x128xf32>
    %cst_266 = arith.constant dense<0.000000e+00> : vector<128xf32>
    %306 = vector.multi_reduction <add>, %305, %cst_266 [0] : vector<8x128xf32> to vector<128xf32>
    %307 = vector.shape_cast %306 : vector<128xf32> to vector<1x128xf32>
    %308 = arith.addf %300, %307 : vector<1x128xf32>
    %c7_267 = arith.constant 7 : index
    %c16_268 = arith.constant 16 : index
    %c0_269 = arith.constant 0 : index
    %309 = vector.load %arg3[%c7_267, %c16_268, %c0_269] : memref<8x40x128xf32, #tpu.memory_space<vmem>>, vector<1x8x128xf32>
    %310 = vector.shape_cast %309 : vector<1x8x128xf32> to vector<8x128xf32>
    %c0_270 = arith.constant 0 : index
    %c16_271 = arith.constant 16 : index
    %c0_272 = arith.constant 0 : index
    %311 = vector.load %arg2[%c0_270, %c16_271, %c0_272] : memref<1x40x128xf32, #tpu.memory_space<vmem>>, vector<1x8x128xf32>
    %312 = vector.shape_cast %311 : vector<1x8x128xf32> to vector<8x128xf32>
    %313 = arith.mulf %310, %312 : vector<8x128xf32>
    %cst_273 = arith.constant dense<0.000000e+00> : vector<128xf32>
    %314 = vector.multi_reduction <add>, %313, %cst_273 [0] : vector<8x128xf32> to vector<128xf32>
    %315 = vector.shape_cast %314 : vector<128xf32> to vector<1x128xf32>
    %316 = arith.addf %308, %315 : vector<1x128xf32>
    %c7_274 = arith.constant 7 : index
    %c24_275 = arith.constant 24 : index
    %c0_276 = arith.constant 0 : index
    %317 = vector.load %arg3[%c7_274, %c24_275, %c0_276] : memref<8x40x128xf32, #tpu.memory_space<vmem>>, vector<1x8x128xf32>
    %318 = vector.shape_cast %317 : vector<1x8x128xf32> to vector<8x128xf32>
    %c0_277 = arith.constant 0 : index
    %c24_278 = arith.constant 24 : index
    %c0_279 = arith.constant 0 : index
    %319 = vector.load %arg2[%c0_277, %c24_278, %c0_279] : memref<1x40x128xf32, #tpu.memory_space<vmem>>, vector<1x8x128xf32>
    %320 = vector.shape_cast %319 : vector<1x8x128xf32> to vector<8x128xf32>
    %321 = arith.mulf %318, %320 : vector<8x128xf32>
    %cst_280 = arith.constant dense<0.000000e+00> : vector<128xf32>
    %322 = vector.multi_reduction <add>, %321, %cst_280 [0] : vector<8x128xf32> to vector<128xf32>
    %323 = vector.shape_cast %322 : vector<128xf32> to vector<1x128xf32>
    %324 = arith.addf %316, %323 : vector<1x128xf32>
    %c7_281 = arith.constant 7 : index
    %c32_282 = arith.constant 32 : index
    %c0_283 = arith.constant 0 : index
    %325 = vector.load %arg3[%c7_281, %c32_282, %c0_283] : memref<8x40x128xf32, #tpu.memory_space<vmem>>, vector<1x8x128xf32>
    %326 = vector.shape_cast %325 : vector<1x8x128xf32> to vector<8x128xf32>
    %c0_284 = arith.constant 0 : index
    %c32_285 = arith.constant 32 : index
    %c0_286 = arith.constant 0 : index
    %327 = vector.load %arg2[%c0_284, %c32_285, %c0_286] : memref<1x40x128xf32, #tpu.memory_space<vmem>>, vector<1x8x128xf32>
    %328 = vector.shape_cast %327 : vector<1x8x128xf32> to vector<8x128xf32>
    %329 = arith.mulf %326, %328 : vector<8x128xf32>
    %cst_287 = arith.constant dense<0.000000e+00> : vector<128xf32>
    %330 = vector.multi_reduction <add>, %329, %cst_287 [0] : vector<8x128xf32> to vector<128xf32>
    %331 = vector.shape_cast %330 : vector<128xf32> to vector<1x128xf32>
    %332 = arith.addf %324, %331 : vector<1x128xf32>
    %c0_288 = arith.constant 0 : index
    %c7_289 = arith.constant 7 : index
    %c0_290 = arith.constant 0 : index
    %333 = vector.load %arg4[%c0_288, %c7_289, %c0_290] : memref<1x8x128xf32, #tpu.memory_space<vmem>>, vector<1x1x128xf32>
    %334 = vector.shape_cast %333 : vector<1x1x128xf32> to vector<1x128xf32>
    %335 = vector.shape_cast %332 : vector<1x128xf32> to vector<1x1x128xf32>
    tpu.vector_store %arg4[%c0_288, %c7_289, %c0_290], %335 {strides = array<i32>} : memref<1x8x128xf32, #tpu.memory_space<vmem>>, vector<1x1x128xf32>,
    return
  }
  func.func @transform_0(%arg0: i32, %arg1: i32) -> (i32, i32, i32) {
    %c0_i32 = arith.constant 0 : i32
    %c0_i32_0 = arith.constant 0 : i32
    return %arg1, %c0_i32, %arg0 : i32, i32, i32
  }
  func.func @transform_1(%arg0: i32, %arg1: i32) -> (i32, i32, i32) {
    %c0_i32 = arith.constant 0 : i32
    %c0_i32_0 = arith.constant 0 : i32
    %c0_i32_1 = arith.constant 0 : i32
    return %c0_i32, %c0_i32_0, %arg0 : i32, i32, i32
  }
  func.func @transform_2(%arg0: i32, %arg1: i32) -> (i32, i32, i32) {
    %c0_i32 = arith.constant 0 : i32
    %c0_i32_0 = arith.constant 0 : i32
    return %arg1, %c0_i32, %arg0 : i32, i32, i32
  }
}

</mosaic_0001>

<bundles_post_ra>
// kernel: tpu_custom_call.1
= control target key start
LH: loop header
LB: loop body
LE: loop exit
PB: predicated region body
PF: predicated region fallthrough
CT: control target
= control target key end

     0   :  { %s1444_s0 = inlined_call_operand.hbm [shape: f32[2,40,256], index: 0, kind: input, shape index: {}]   ;;  %s1445_s1 = inlined_call_operand.hbm [shape: f32[8,40,256], index: 1, kind: input, shape index: {}]   ;;  %s1446_s2 = inlined_call_operand.hbm [shape: f32[2,8,256], index: 2, kind: output, shape index: {}]  }
   0x1   :  { %1451 = sst [smem:[#allocation15_spill]] %s1444_s0 }
   0x2   :  { %7 = vsyncpa [#allocation3], 0 }
   0x3   :  { %9 = vsyncpa [#allocation3 + $0x1], 0 }
   0x4   :  { %10 = vsyncpa [#allocation6], 0 }
   0x5   :  { %12 = vsyncpa [#allocation6 + $0x1], 0 }
   0x6   :  { %13 = vsyncpa [#allocation4], 0 }
   0x7   :  { %15 = vsyncpa [#allocation4 + $0x1], 0  ;;  %s1124_s9 = smov 0   ;;  %s1126_s10 = smov 0  }
   0x8   :  { %s1128_s11 = smov 0   ;;  %s1130_s12 = smov 0  }
   0x9   :  { %s1132_s13 = smov 0   ;;  %s1134_s14 = smov 0  }
   0xa   :  { %s1136_s15 = smov 0   ;;  %s1138_s16 = smov 0  }
   0xb   :  { %s1140_s17 = smov 0   ;;  %s1142_s18 = smov 0  }
   0xc   :  { %s1144_s19 = smov 0  }
   0xd LB: > { %1452 = sst [smem:[#allocation11_spill]] %s1096_s17  ;;  %s755_s20 = sadd.s32 4294967295, %s1104_s19   ;;  %s1104_s19 = sphi %s1144_s19, %s21_s19   ;;  %s1100_s18 = sphi %s1142_s18, %s1476_s18   ;;  %s1096_s17 = sphi %s1140_s17, %s1467_s17   ;;  %s1092_s16 = sphi %s1138_s16, %s1475_s16   ;;  %s1088_s15 = sphi %s1136_s15, %s1466_s15   ;;  %s1084_s14 = sphi %s1134_s14, %s1474_s14   ;;  %s1080_s13 = sphi %s1132_s13, %s1473_s13   ;;  %s1076_s12 = sphi %s1130_s12, %s1472_s12   ;;  %s1072_s11 = sphi %s1128_s11, %s1471_s11   ;;  %s1068_s10 = sphi %s1126_s10, %s1470_s10   ;;  %s1064_s9 = sphi %s1124_s9, %s1469_s9  }
   0xe   : > { %s756_s21 = sadd.s32 4294967294, %s1104_s19   ;;  %s30_s22 = sadd.s32 1, %s1096_s17 }
   0xf   : > { %s33_s23 = sadd.s32 1, %s1100_s18  ;;  %p31_p0 = scmp.ge.s32.totalorder %s30_s22, 2 }
  0x10   : > { %s42_s24 = sadd.s32 1, %s1084_s14  ;;  %p49_p1 = scmp.ne.s32.totalorder %s1084_s14, %s1080_s13 }
  0x11   : > { %p50_p2 = scmp.eq.s32.totalorder %s1104_s19, 0  ;;  %s1478_s22 = smov (%p31_p0, %s30_s22), 0 }
  0x12   : > { %1453 = sst [smem:[#allocation12_spill]] %s1478_s22  ;;  %s1480_s23 = smov (!%p31_p0, %s33_s23), %s1100_s18 }
  0x13   : > { %s37_s25 = ssub.s32 %s1096_s17, %s1478_s22  ;;  %p1194_p3 = por %p50_p2, %p49_p1 }
  0x14   : > { %p35_p4 = scmp.ge.s32.totalorder %s1480_s23, 2  ;;  %p55_p5 = scmp.ne.s32.totalorder %s1080_s13, %s1076_s12 }
  0x15   : > { %p1200_p6 = scmp.eq.s32.totalorder %s755_s20, 0  ;;  %p107_p7 = scmp.eq.s32.totalorder %s755_s20, 3 }
  0x16   : > { %s1482_s23 = smov (%p35_p4, %s1480_s23), 0  ;;  %p113_p10 = scmp.eq.s32.totalorder %s756_s21, 3 }
  0x17   : > { %1456 = sst [smem:[#allocation13_spill]] %s1482_s23  ;;  %p1208_p8 = por %p1200_p6, %p55_p5 }
  0x18   : > { %p1212_p9 = por %p107_p7, %p49_p1  ;;  %s1218_s30 = ssub.s32 %s1100_s18, %s1482_s23 }
  0x19   : > { %s39_s3 = sor.u32 %s1218_s30, %s37_s25  ;;  %p66_p11 = scmp.eq.s32.totalorder %s1218_s30, 0 }
  0x1a   : > { %p40_p12 = scmp.eq.s32.totalorder %s39_s3, 0  ;;  %p1222_p13 = por %p113_p10, %p55_p5 }
  0x1b   : > { %p1450_p0 = scmp.lt.s32.totalorder %s1104_s19, 4  ;;  %s133_s6 = sand.u32 1, %s1084_s14  }
  0x1c   : > { %s1228_s5 = scalar_select %p40_p12, %s1084_s14, %s42_s24  }
  0x1d   : > { %s804_s7 = smul.u32 10, %s1096_s17  ;;  %p815_p1 = pnand %p1450_p0, %p1194_p3 }
  0x1e   : > { %1460 = sst [smem:[#allocation14_spill]] %s1228_s5  ;;  %s803_s8 = smul.u32 40, %s133_s6 }
  0x1f   : > { %s141_s20 = sadd.s32 %s1100_s18, %s804_s7  ;;  %s1461_s0 = sld [smem:[#allocation15_spill]] }
  0x20   : > { %s759_s21 = sshll.u32 %s141_s20, 3  ;;  %s137_s24 = scalar_lea.vmem [#allocation2], %s803_s8 }
  0x21   : > { %s146_s22 = sshll.u32 %s137_s24, 4  ;;  %p761_p3 = scmp.ge.s32.totalorder %s1104_s19, 1  ;;  %s147_s22 = int_to_ptr.vmem [resolvable:$true] %s146_s22 }
  0x22   : > { %s134_s26 = scalar_lea.sflag [#allocation3], %s133_s6  ;;  %s1106_s7 = smov 256  }
  0x23   : > { %s1107_s20 = smov 128   ;;  %s1108_s25 = smov 8  }
  0x24   : > { %p175_p4 = scmp.lt.s32.totalorder %s1104_s19, 5  ;;  %p75_p7 = scmp.ne.s32.totalorder %s1072_s11, %s1068_s10 }
  0x25   : > { %s143_s23 = scalar_lea.hbm %s1461_s0, %s759_s21  ;;  %s68_s21 = sadd.s32 1, %s1072_s11 }
  0x26   : > { %s144_s17 = sshll.u32 %s143_s23, 4  ;;  %p1242_p5 = pnand %p761_p3, %p175_p4  ;;  %s145_s17 = int_to_ptr.hbm [resolvable:$true] %s144_s17 }
  0x27   : > { %817 = dma.hbm_to_vmem [thread:$0]  (!%p815_p1), %s145_s17, 640, %s147_s22, %s134_s26, %s1106_s7, %s1107_s20, %s1108_s25  }
  0x28   : > { %s1252_s23 = scalar_select %p66_p11, %s1072_s11, %s68_s21  }
  0x29   : > { %p77_p10 = por %p75_p7, %p50_p2  ;;  %p81_p12 = scmp.ne.s32.totalorder %s1068_s10, %s1064_s9 }
  0x2a   : > { %s156_s3 = sand.u32 1, %s1072_s11   ;;  %s760_s6 = sshll.u32 %s1100_s18, 3 }
  0x2b   : > { %p1262_p0 = por %p81_p12, %p1200_p6  ;;  %s805_s17 = smul.u32 320, %s156_s3 }
  0x2c   : > { %s164_s0 = scalar_lea.hbm %s1445_s1, %s760_s6  ;;  %p1464_p1 = scmp.lt.s32.totalorder %s1104_s19, 4 }
  0x2d   : > { %s165_s5 = sshll.u32 %s164_s0, 4  ;;  %s160_s30 = scalar_lea.vmem [#allocation5], %s805_s17  ;;  %s166_s5 = int_to_ptr.hbm [resolvable:$true] %s165_s5 }
  0x2e   : > { %p818_p3 = pnand %p1464_p1, %p77_p10  ;;  %s167_s21 = sshll.u32 %s160_s30, 4  ;;  %s168_s21 = int_to_ptr.vmem [resolvable:$true] %s167_s21 }
  0x2f   : > { %s157_s9 = scalar_lea.sflag [#allocation6], %s156_s3  ;;  %179 = sbr.rel (%p1242_p5) target bundleno = 151 (0x97), region = 28 }
  0x30   : > { %820 = dma.hbm_to_vmem [thread:$0]  (!%p818_p3), %s166_s5, 5120, %s168_s21, %s157_s9, %s1106_s7, %s1107_s20, %s1108_s25  }
  0x31   : > { %s1274_s27 = sand.u32 (!%p1242_p5), 1, %s1080_s13  }
  0x32   : > { %s806_s22 = smul.u32 (!%p1242_p5), 40, %s1274_s27  ;;  %s182_s6 = scalar_lea.sflag (!%p1242_p5), [#allocation3], %s1274_s27 }
  0x34   : > { %s185_s0 = scalar_lea.vmem [#allocation2], %s806_s22 }
  0x35   : > { %1051 = dma.done.wait (%p1208_p8), %s182_s6, 640  }
  0x36   : > { %1053 = vsyncadd (%p1208_p8), %s182_s6, 4294966656  ;;  %s191_s5 = sand.u32 1, %s1068_s10  }
  0x37   : > { %s807_s7 = smul.u32 320, %s191_s5  ;;  %s192_s20 = scalar_lea.sflag [#allocation6], %s191_s5 }
  0x39   : > { %s1283_s25 = scalar_lea.vmem [#allocation5], %s807_s7 }
  0x3a   : > { %1055 = dma.done.wait (%p1262_p0), %s192_s20, 5120  }
  0x3b   : > { %1057 = vsyncadd (%p1262_p0), %s192_s20, 4294962176  ;;  %v222_v0 = vld [vmem:[%s1283_s25] sm:$0xff]  ;;  %v1290_v1 = vld [vmem:[%s185_s0] sm:$0xff]  ;;  %s762_s28 = sshll.u32 %s1274_s27, 3  ;;  %s799_s3 = sshll.u32 %s1088_s15, 1 }
  0x3c   : > { %v231_v2 = vld [vmem:[%s1283_s25 + $0x8] sm:$0xff]  ;;  %v224_v3 = vmul.f32 %v1290_v1, %v222_v0  ;;  %v1294_v4 = vld [vmem:[%s185_s0 + $0x8] sm:$0xff]  ;;  %v241_v5 = vld [vmem:[%s1283_s25 + $0x10] sm:$0xff]  ;;  %s1331_s8 = scalar_lea.vmem [#allocation7], %s762_s28  ;;  %s640_s24 = sadd.s32 %s1092_s16, %s799_s3 }
  0x3d   : > { %v1297_v6 = vld [vmem:[%s185_s0 + $0x10] sm:$0xff]  ;;  %v233_v7 = vmul.f32 %v1294_v4, %v231_v2  ;;  %v251_v9 = vld [vmem:[%s1283_s25 + $0x18] sm:$0xff]  ;;  %v1302_v10 = vld [vmem:[%s185_s0 + $0x18] sm:$0xff]  ;;  %s800_s15 = sshll.u32 %s640_s24, 3  ;;  %s644_s30 = sshll.u32 %s1331_s8, 4  ;;  %s645_s30 = int_to_ptr.vmem [resolvable:$true] %s644_s30 }
  0x3e   : > { %v243_v8 = vmul.f32 %v1297_v6, %v241_v5  ;;  %v261_v11 = vld [vmem:[%s1283_s25 + $0x20] sm:$0xff]  ;;  %v225_v12 = vrot.slane %v224_v3, 4  ;;  %v253_v13 = vmul.f32 %v1302_v10, %v251_v9  ;;  %v1306_v14 = vld [vmem:[%s185_s0 + $0x20] sm:$0xff]  ;;  %v763_v15 = vld [vmem:[%s1283_s25 + $0x28] sm:$0xff]  ;;  %s642_s26 = scalar_lea.hbm %s1446_s2, %s800_s15  ;;  %s630_s9 = scalar_lea.sflag [#allocation4], %s1274_s27 }
  0x3f   : > { %v764_v16 = vld [vmem:[%s1283_s25 + $0x30] sm:$0xff]  ;;  %v234_v17 = vrot.slane %v233_v7, 4  ;;  %v263_v19 = vmul.f32 %v1306_v14, %v261_v11  ;;  %v275_v20 = vmul.f32 %v763_v15, %v1290_v1  ;;  %v765_v21 = vld [vmem:[%s1283_s25 + $0x38] sm:$0xff]  ;;  %v766_v54 = vld [vmem:[%s1283_s25 + $0x40] sm:$0xff]  ;;  %s646_s21 = sshll.u32 %s642_s26, 4  ;;  %s998_s7 = scalar_lea.hbm %s1446_s2, 32  ;;  %s647_s21 = int_to_ptr.hbm [resolvable:$true] %s646_s21 }
  0x40   : > { %v244_v18 = vrot.slane %v243_v8, 4  ;;  %v226_v22 = vadd.f32 %v225_v12, %v224_v3  ;;  %v254_v23 = vrot.slane %v253_v13, 4  ;;  %v284_v24 = vmul.f32 %v764_v16, %v1294_v4  ;;  %v767_v59 = vld [vmem:[%s1283_s25 + $0x48] sm:$0xff]  ;;  %v768_v0 = vld [vmem:[%s1283_s25 + $0x50] sm:$0xff]  ;;  %v770_v9 = vld [vmem:[%s1283_s25 + $0x60] sm:$0xff]  ;;  %s992_s22 = sshra.s32 %s647_s21, 4  ;;  %s993_s22 = int_to_ptr.hbm [resolvable:$true] %s992_s22 }
  0x41   : > { %v294_v25 = vmul.f32 %v765_v21, %v1297_v6  ;;  %v235_v26 = vadd.f32 %v234_v17, %v233_v7  ;;  %v264_v28 = vrot.slane %v263_v19, 4  ;;  %v276_v29 = vrot.slane %v275_v20, 4  ;;  %v771_v16 = vld [vmem:[%s1283_s25 + $0x68] sm:$0xff]  ;;  %s994_s6 = scalar_lea.hbm %s993_s22, 8  ;;  %p999_p11 = scmp.lt.s32.totalorder %s993_s22, %s1446_s2 }
  0x42   : > { %v245_v27 = vadd.f32 %v244_v18, %v243_v8  ;;  %v227_v30 = vrot.slane %v226_v22, 2  ;;  %v255_v31 = vadd.f32 %v254_v23, %v253_v13  ;;  %v285_v32 = vrot.slane %v284_v24, 4  ;;  %v769_v8 = vld [vmem:[%s1283_s25 + $0x58] sm:$0xff]  ;;  %p995_p2 = scmp.ne.s32.totalorder %s993_s22, %s994_s6  ;;  %p1000_p0 = scmp.lt.s32.totalorder %s998_s7, %s994_s6 }
  0x43   : > { %v295_v33 = vrot.slane %v294_v25, 4  ;;  %v236_v34 = vrot.slane %v235_v26, 2  ;;  %v265_v36 = vadd.f32 %v264_v28, %v263_v19  ;;  %v277_v37 = vadd.f32 %v276_v29, %v275_v20 }
  0x44   : > { %v246_v35 = vrot.slane %v245_v27, 2  ;;  %v228_v38 = vadd.f32 %v227_v30, %v226_v22  ;;  %v256_v39 = vrot.slane %v255_v31, 2  ;;  %v286_v40 = vadd.f32 %v285_v32, %v284_v24  ;;  %p996_p6 = pnand %p995_p2, %p1212_p9  ;;  %p1001_p4 = por %p1000_p0, %p999_p11 }
  0x45   : > { %v296_v41 = vadd.f32 %v295_v33, %v294_v25  ;;  %v237_v42 = vadd.f32 %v236_v34, %v235_v26  ;;  %v266_v44 = vrot.slane %v265_v36, 2  ;;  %v278_v45 = vrot.slane %v277_v37, 2  ;;  %v772_v33 = vld [vmem:[%s1283_s25 + $0x70] sm:$0xff] }
  0x46   : > { %v247_v43 = vadd.f32 %v246_v35, %v245_v27  ;;  %v229_v46 = vrot.slane %v228_v38, 1  ;;  %v257_v47 = vadd.f32 %v256_v39, %v255_v31  ;;  %v287_v48 = vrot.slane %v286_v40, 2  ;;  %p997_p8 = pneg %p996_p6 }
  0x47   : > { %v297_v49 = vrot.slane %v296_v41, 2  ;;  %v238_v50 = vrot.slane %v237_v42, 1  ;;  %v267_v52 = vadd.f32 %v266_v44, %v265_v36  ;;  %v279_v53 = vadd.f32 %v278_v45, %v277_v37 }
  0x48   : > { %v248_v51 = vrot.slane %v247_v43, 1  ;;  %v230_v55 = vadd.f32 %v229_v46, %v228_v38  ;;  %v258_v56 = vrot.slane %v257_v47, 1  ;;  %v288_v57 = vadd.f32 %v287_v48, %v286_v40  ;;  %v773_v38 = vld [vmem:[%s1283_s25 + $0x78] sm:$0xff]  ;;  %p1002_p5 = pnand %p1001_p4, %p997_p8 }
  0x49   : > { %v298_v58 = vadd.f32 %v297_v49, %v296_v41  ;;  %v239_v60 = vadd.f32 %v238_v50, %v237_v42  ;;  %v268_v62 = vrot.slane %v267_v52, 1  ;;  %v280_v63 = vrot.slane %v279_v53, 1 }
  0x4a   : > { %v249_v61 = vadd.f32 %v248_v51, %v247_v43  ;;  %v259_v2 = vadd.f32 %v258_v56, %v257_v47  ;;  %v289_v3 = vrot.slane %v288_v57, 1  ;;  %v304_v7 = vmul.f32 %v766_v54, %v1302_v10 }
  0x4b   : > { %v299_v5 = vrot.slane %v298_v58, 1  ;;  %v240_v11 = vadd.f32 %v239_v60, %v230_v55  ;;  %v269_v12 = vadd.f32 %v268_v62, %v267_v52  ;;  %v281_v13 = vadd.f32 %v280_v63, %v279_v53  ;;  %v774_v63 = vld [vmem:[%s1283_s25 + $0x80] sm:$0xff] }
  0x4c   : > { %v314_v15 = vmul.f32 %v767_v59, %v1306_v14  ;;  %v290_v17 = vadd.f32 %v289_v3, %v288_v57  ;;  %v305_v19 = vrot.slane %v304_v7, 4  ;;  %v326_v20 = vmul.f32 %v768_v0, %v1290_v1 }
  0x4d   : > { %v300_v18 = vadd.f32 %v299_v5, %v298_v58  ;;  %v250_v21 = vadd.f32 %v249_v61, %v240_v11  ;;  %v335_v23 = vmul.f32 %v769_v8, %v1294_v4  ;;  %v345_v24 = vmul.f32 %v770_v9, %v1297_v6 }
  0x4e   : > { %v315_v22 = vrot.slane %v314_v15, 4  ;;  %v291_v25 = vadd.f32 %v290_v17, %v281_v13  ;;  %v306_v26 = vadd.f32 %v305_v19, %v304_v7  ;;  %v327_v27 = vrot.slane %v326_v20, 4  ;;  %v775_v7 = vld [vmem:[%s1283_s25 + $0x88] sm:$0xff]  ;;  %v776_v13 = vld [vmem:[%s1283_s25 + $0x90] sm:$0xff]  ;;  %v777_v19 = vld [vmem:[%s1283_s25 + $0x98] sm:$0xff] }
  0x4f   : > { %v355_v28 = vmul.f32 %v771_v16, %v1302_v10  ;;  %v260_v29 = vadd.f32 %v259_v2, %v250_v21  ;;  %v336_v31 = vrot.slane %v335_v23, 4  ;;  %v346_v32 = vrot.slane %v345_v24, 4 }
  0x50   : > { %v316_v30 = vadd.f32 %v315_v22, %v314_v15  ;;  %v301_v34 = vadd.f32 %v300_v18, %v291_v25  ;;  %v307_v35 = vrot.slane %v306_v26, 2  ;;  %v328_v36 = vadd.f32 %v327_v27, %v326_v20  ;;  %v778_v20 = vld [vmem:[%s1283_s25 + $0xa0] sm:$0xff] }
  0x51   : > { %v356_v37 = vrot.slane %v355_v28, 4  ;;  %v270_v39 = vadd.f32 %v269_v12, %v260_v29  ;;  %v337_v41 = vadd.f32 %v336_v31, %v335_v23  ;;  %v347_v42 = vadd.f32 %v346_v32, %v345_v24 }
  0x52   : > { %v317_v40 = vrot.slane %v316_v30, 2  ;;  %v308_v43 = vadd.f32 %v307_v35, %v306_v26  ;;  %v329_v44 = vrot.slane %v328_v36, 2  ;;  %v365_v46 = vmul.f32 %v772_v33, %v1306_v14 }
  0x53   : > { %v357_v45 = vadd.f32 %v356_v37, %v355_v28  ;;  %271 = vst [vmem:[%s1331_s8] sm:$0x1] %v270_v39  ;;  %v338_v48 = vrot.slane %v337_v41, 2  ;;  %v348_v49 = vrot.slane %v347_v42, 2  ;;  %v377_v50 = vmul.f32 %v773_v38, %v1290_v1  ;;  %v779_v37 = vld [vmem:[%s1283_s25 + $0xa8] sm:$0xff] }
  0x54   : > { %v318_v47 = vadd.f32 %v317_v40, %v316_v30  ;;  %v309_v51 = vrot.slane %v308_v43, 1  ;;  %v330_v52 = vadd.f32 %v329_v44, %v328_v36  ;;  %v366_v54 = vrot.slane %v365_v46, 4 }
  0x55   : > { %v358_v53 = vrot.slane %v357_v45, 2  ;;  %v339_v56 = vadd.f32 %v338_v48, %v337_v41  ;;  %v349_v57 = vadd.f32 %v348_v49, %v347_v42  ;;  %v378_v58 = vrot.slane %v377_v50, 4  ;;  %v780_v42 = vld [vmem:[%s1283_s25 + $0xb0] sm:$0xff] }
  0x56   : > { %v319_v55 = vrot.slane %v318_v47, 1  ;;  %v310_v59 = vadd.f32 %v309_v51, %v308_v43  ;;  %v331_v60 = vrot.slane %v330_v52, 1  ;;  %v367_v62 = vadd.f32 %v366_v54, %v365_v46  ;;  %v781_v51 = vld [vmem:[%s1283_s25 + $0xb8] sm:$0xff] }
  0x57   : > { %v359_v61 = vadd.f32 %v358_v53, %v357_v45  ;;  %v340_v2 = vrot.slane %v339_v56, 1  ;;  %v350_v3 = vrot.slane %v349_v57, 1  ;;  %v379_v5 = vadd.f32 %v378_v58, %v377_v50 }
  0x58   : > { %v320_v0 = vadd.f32 %v319_v55, %v318_v47  ;;  %v311_v8 = vadd.f32 %v310_v59, %v301_v34  ;;  %v332_v9 = vadd.f32 %v331_v60, %v330_v52  ;;  %v368_v12 = vrot.slane %v367_v62, 2 }
  0x59   : > { %v360_v11 = vrot.slane %v359_v61, 1  ;;  %v341_v15 = vadd.f32 %v340_v2, %v339_v56  ;;  %v351_v16 = vadd.f32 %v350_v3, %v349_v57  ;;  %v380_v17 = vrot.slane %v379_v5, 2 }
  0x5a   : > { %v386_v18 = vmul.f32 %v774_v63, %v1294_v4  ;;  %v321_v21 = vadd.f32 %v320_v0, %v311_v8  ;;  %v369_v23 = vadd.f32 %v368_v12, %v367_v62  ;;  %v396_v24 = vmul.f32 %v775_v7, %v1297_v6  ;;  %v782_v12 = vld [vmem:[%s1283_s25 + $0xc0] sm:$0xff] }
  0x5b   : > { %v361_v22 = vadd.f32 %v360_v11, %v359_v61  ;;  %v342_v25 = vadd.f32 %v341_v15, %v332_v9  ;;  %v381_v26 = vadd.f32 %v380_v17, %v379_v5  ;;  %v406_v28 = vmul.f32 %v776_v13, %v1302_v10 }
  0x5c   : > { %v387_v27 = vrot.slane %v386_v18, 4  ;;  %322 = vst [vmem:[%s1331_s8 + $0x1] sm:$0x1] %v321_v21  ;;  %v370_v29 = vrot.slane %v369_v23, 1  ;;  %v397_v30 = vrot.slane %v396_v24, 4  ;;  %v416_v31 = vmul.f32 %v777_v19, %v1306_v14 }
  0x5d   : > { %v428_v32 = vmul.f32 %v778_v20, %v1290_v1  ;;  %v352_v33 = vadd.f32 %v351_v16, %v342_v25  ;;  %v382_v34 = vrot.slane %v381_v26, 1  ;;  %v407_v36 = vrot.slane %v406_v28, 4 }
  0x5e   : > { %v388_v35 = vadd.f32 %v387_v27, %v386_v18  ;;  %v371_v38 = vadd.f32 %v370_v29, %v369_v23  ;;  %v398_v39 = vadd.f32 %v397_v30, %v396_v24  ;;  %v417_v40 = vrot.slane %v416_v31, 4  ;;  %v783_v18 = vld [vmem:[%s1283_s25 + $0xc8] sm:$0xff]  ;;  %v784_v23 = vld [vmem:[%s1283_s25 + $0xd0] sm:$0xff]  ;;  %v785_v24 = vld [vmem:[%s1283_s25 + $0xd8] sm:$0xff] }
  0x5f   : > { %v429_v41 = vrot.slane %v428_v32, 4  ;;  %v362_v43 = vadd.f32 %v361_v22, %v352_v33  ;;  %v383_v44 = vadd.f32 %v382_v34, %v381_v26  ;;  %v408_v46 = vadd.f32 %v407_v36, %v406_v28 }
  0x60   : > { %v389_v45 = vrot.slane %v388_v35, 2  ;;  %v399_v47 = vrot.slane %v398_v39, 2  ;;  %v418_v48 = vadd.f32 %v417_v40, %v416_v31  ;;  %v437_v50 = vmul.f32 %v779_v37, %v1294_v4 }
  0x61   : > { %v430_v49 = vadd.f32 %v429_v41, %v428_v32  ;;  %v372_v52 = vadd.f32 %v371_v38, %v362_v43  ;;  %v409_v54 = vrot.slane %v408_v46, 2  ;;  %v447_v55 = vmul.f32 %v780_v42, %v1297_v6 }
  0x62   : > { %v390_v53 = vadd.f32 %v389_v45, %v388_v35  ;;  %v400_v56 = vadd.f32 %v399_v47, %v398_v39  ;;  %v419_v57 = vrot.slane %v418_v48, 2  ;;  %v438_v59 = vrot.slane %v437_v50, 4  ;;  %v786_v45 = vld [vmem:[%s1283_s25 + $0xe0] sm:$0xff] }
  0x63   : > { %v431_v58 = vrot.slane %v430_v49, 2  ;;  %373 = vst [vmem:[%s1331_s8 + $0x2] sm:$0x1] %v372_v52  ;;  %v410_v61 = vadd.f32 %v409_v54, %v408_v46  ;;  %v448_v62 = vrot.slane %v447_v55, 4  ;;  %v457_v63 = vmul.f32 %v781_v51, %v1302_v10  ;;  %v787_v46 = vld [vmem:[%s1283_s25 + $0xe8] sm:$0xff] }
  0x64   : > { %v391_v60 = vrot.slane %v390_v53, 1  ;;  %v401_v0 = vrot.slane %v400_v56, 1  ;;  %v420_v2 = vadd.f32 %v419_v57, %v418_v48  ;;  %v439_v5 = vadd.f32 %v438_v59, %v437_v50 }
  0x65   : > { %v432_v3 = vadd.f32 %v431_v58, %v430_v49  ;;  %v411_v8 = vrot.slane %v410_v61, 1  ;;  %v449_v9 = vadd.f32 %v448_v62, %v447_v55  ;;  %v458_v11 = vrot.slane %v457_v63, 4  ;;  %v788_v55 = vld [vmem:[%s1283_s25 + $0xf0] sm:$0xff] }
  0x66   : > { %v392_v7 = vadd.f32 %v391_v60, %v390_v53  ;;  %v402_v13 = vadd.f32 %v401_v0, %v400_v56  ;;  %v421_v15 = vrot.slane %v420_v2, 1  ;;  %v440_v17 = vrot.slane %v439_v5, 2 }
  0x67   : > { %v433_v16 = vrot.slane %v432_v3, 1  ;;  %v412_v20 = vadd.f32 %v411_v8, %v410_v61  ;;  %v450_v21 = vrot.slane %v449_v9, 2  ;;  %v459_v22 = vadd.f32 %v458_v11, %v457_v63 }
  0x68   : > { %v393_v19 = vadd.f32 %v392_v7, %v383_v44  ;;  %v422_v25 = vadd.f32 %v421_v15, %v420_v2  ;;  %v441_v27 = vadd.f32 %v440_v17, %v439_v5  ;;  %v467_v28 = vmul.f32 %v782_v12, %v1306_v14  ;;  %v789_v7 = vld [vmem:[%s1283_s25 + $0xf8] sm:$0xff] }
  0x69   : > { %v434_v26 = vadd.f32 %v433_v16, %v432_v3  ;;  %v451_v30 = vadd.f32 %v450_v21, %v449_v9  ;;  %v460_v31 = vrot.slane %v459_v22, 2  ;;  %v479_v32 = vmul.f32 %v783_v18, %v1290_v1 }
  0x6a   : > { %v403_v29 = vadd.f32 %v402_v13, %v393_v19  ;;  %v442_v33 = vrot.slane %v441_v27, 1  ;;  %v468_v34 = vrot.slane %v467_v28, 4  ;;  %v488_v35 = vmul.f32 %v784_v23, %v1294_v4 }
  0x6b   : > { %v498_v36 = vmul.f32 %v785_v24, %v1297_v6  ;;  %v452_v38 = vrot.slane %v451_v30, 1  ;;  %v461_v39 = vadd.f32 %v460_v31, %v459_v22  ;;  %v480_v40 = vrot.slane %v479_v32, 4  ;;  %v790_v22 = vld [vmem:[%s1283_s25 + $0x100] sm:$0xff] }
  0x6c   : > { %v413_v37 = vadd.f32 %v412_v20, %v403_v29  ;;  %v443_v41 = vadd.f32 %v442_v33, %v441_v27  ;;  %v469_v42 = vadd.f32 %v468_v34, %v467_v28  ;;  %v489_v43 = vrot.slane %v488_v35, 4  ;;  %v791_v27 = vld [vmem:[%s1283_s25 + $0x108] sm:$0xff]  ;;  %v792_v28 = vld [vmem:[%s1283_s25 + $0x110] sm:$0xff] }
  0x6d   : > { %v499_v44 = vrot.slane %v498_v36, 4  ;;  %v453_v48 = vadd.f32 %v452_v38, %v451_v30  ;;  %v462_v49 = vrot.slane %v461_v39, 1  ;;  %v481_v50 = vadd.f32 %v480_v40, %v479_v32 }
  0x6e   : > { %v423_v47 = vadd.f32 %v422_v25, %v413_v37  ;;  %v444_v51 = vadd.f32 %v443_v41, %v434_v26  ;;  %v470_v52 = vrot.slane %v469_v42, 2  ;;  %v490_v53 = vadd.f32 %v489_v43, %v488_v35 }
  0x6f   : > { %v500_v54 = vadd.f32 %v499_v44, %v498_v36  ;;  %v463_v56 = vadd.f32 %v462_v49, %v461_v39  ;;  %v482_v57 = vrot.slane %v481_v50, 2  ;;  %v508_v58 = vmul.f32 %v786_v45, %v1302_v10  ;;  %v793_v45 = vld [vmem:[%s1283_s25 + $0x118] sm:$0xff] }
  0x70   : > { %424 = vst [vmem:[%s1331_s8 + $0x3] sm:$0x1] %v423_v47  ;;  %v518_v59 = vmul.f32 %v787_v46, %v1306_v14  ;;  %v454_v60 = vadd.f32 %v453_v48, %v444_v51  ;;  %v471_v61 = vadd.f32 %v470_v52, %v469_v42  ;;  %v491_v62 = vrot.slane %v490_v53, 2 }
  0x71   : > { %v501_v63 = vrot.slane %v500_v54, 2  ;;  %v483_v0 = vadd.f32 %v482_v57, %v481_v50  ;;  %v509_v2 = vrot.slane %v508_v58, 4  ;;  %v530_v5 = vmul.f32 %v788_v55, %v1290_v1  ;;  %v794_v50 = vld [vmem:[%s1283_s25 + $0x120] sm:$0xff] }
  0x72   : > { %v519_v3 = vrot.slane %v518_v59, 4  ;;  %v464_v8 = vadd.f32 %v463_v56, %v454_v60  ;;  %v472_v9 = vrot.slane %v471_v61, 1  ;;  %v492_v11 = vadd.f32 %v491_v62, %v490_v53 }
  0x73   : > { %v502_v12 = vadd.f32 %v501_v63, %v500_v54  ;;  %v484_v13 = vrot.slane %v483_v0, 1  ;;  %v510_v15 = vadd.f32 %v509_v2, %v508_v58  ;;  %v531_v17 = vrot.slane %v530_v5, 4 }
  0x74   : > { %v520_v16 = vadd.f32 %v519_v3, %v518_v59  ;;  %v473_v18 = vadd.f32 %v472_v9, %v471_v61  ;;  %v493_v19 = vrot.slane %v492_v11, 1  ;;  %v539_v21 = vmul.f32 %v789_v7, %v1294_v4  ;;  %v795_v59 = vld [vmem:[%s1283_s25 + $0x128] sm:$0xff]  ;;  %v796_v7 = vld [vmem:[%s1283_s25 + $0x130] sm:$0xff] }
  0x75   : > { %v503_v20 = vrot.slane %v502_v12, 1  ;;  %v485_v23 = vadd.f32 %v484_v13, %v483_v0  ;;  %v511_v24 = vrot.slane %v510_v15, 2  ;;  %v532_v26 = vadd.f32 %v531_v17, %v530_v5 }
  0x76   : > { %v521_v25 = vrot.slane %v520_v16, 2  ;;  %v474_v29 = vadd.f32 %v473_v18, %v464_v8  ;;  %v494_v30 = vadd.f32 %v493_v19, %v492_v11  ;;  %v540_v32 = vrot.slane %v539_v21, 4 }
  0x77   : > { %v504_v31 = vadd.f32 %v503_v20, %v502_v12  ;;  %v512_v33 = vadd.f32 %v511_v24, %v510_v15  ;;  %v533_v35 = vrot.slane %v532_v26, 2  ;;  %v549_v36 = vmul.f32 %v790_v22, %v1297_v6  ;;  %v797_v20 = vld [vmem:[%s1283_s25 + $0x138] sm:$0xff] }
  0x78   : > { %v522_v34 = vadd.f32 %v521_v25, %v520_v16  ;;  %475 = vst [vmem:[%s1331_s8 + $0x4] sm:$0x1] %v474_v29  ;;  %v495_v37 = vadd.f32 %v494_v30, %v485_v23  ;;  %v541_v38 = vadd.f32 %v540_v32, %v539_v21  ;;  %v559_v39 = vmul.f32 %v791_v27, %v1302_v10 }
  0x79   : > { %v569_v40 = vmul.f32 %v792_v28, %v1306_v14  ;;  %v513_v41 = vrot.slane %v512_v33, 1  ;;  %v534_v43 = vadd.f32 %v533_v35, %v532_v26  ;;  %v550_v44 = vrot.slane %v549_v36, 4 }
  0x7a   : > { %v523_v42 = vrot.slane %v522_v34, 1  ;;  %v505_v46 = vadd.f32 %v504_v31, %v495_v37  ;;  %v542_v47 = vrot.slane %v541_v38, 2  ;;  %v560_v48 = vrot.slane %v559_v39, 4 }
  0x7b   : > { %v570_v49 = vrot.slane %v569_v40, 4  ;;  %v514_v51 = vadd.f32 %v513_v41, %v512_v33  ;;  %v535_v53 = vrot.slane %v534_v43, 1  ;;  %v551_v54 = vadd.f32 %v550_v44, %v549_v36 }
  0x7c   : > { %v524_v52 = vadd.f32 %v523_v42, %v522_v34  ;;  %v543_v55 = vadd.f32 %v542_v47, %v541_v38  ;;  %v561_v56 = vadd.f32 %v560_v48, %v559_v39  ;;  %v581_v58 = vmul.f32 %v793_v45, %v1290_v1 }
  0x7d   : > { %v571_v57 = vadd.f32 %v570_v49, %v569_v40  ;;  %v515_v60 = vadd.f32 %v514_v51, %v505_v46  ;;  %v536_v61 = vadd.f32 %v535_v53, %v534_v43  ;;  %v552_v62 = vrot.slane %v551_v54, 2 }
  0x7e   : > { %v590_v63 = vmul.f32 %v794_v50, %v1294_v4  ;;  %v544_v0 = vrot.slane %v543_v55, 1  ;;  %v562_v2 = vrot.slane %v561_v56, 2  ;;  %v582_v5 = vrot.slane %v581_v58, 4 }
  0x7f   : > { %v572_v3 = vrot.slane %v571_v57, 2  ;;  %v525_v8 = vadd.f32 %v524_v52, %v515_v60  ;;  %v553_v9 = vadd.f32 %v552_v62, %v551_v54  ;;  %v600_v12 = vmul.f32 %v795_v59, %v1297_v6 }
  0x80   : > { %v591_v11 = vrot.slane %v590_v63, 4  ;;  %v545_v13 = vadd.f32 %v544_v0, %v543_v55  ;;  %v563_v1 = vadd.f32 %v562_v2, %v561_v56  ;;  %v583_v16 = vadd.f32 %v582_v5, %v581_v58 }
  0x81   : > { %v573_v15 = vadd.f32 %v572_v3, %v571_v57  ;;  %526 = vst [vmem:[%s1331_s8 + $0x5] sm:$0x1] %v525_v8  ;;  %v554_v17 = vrot.slane %v553_v9, 1  ;;  %v601_v4 = vrot.slane %v600_v12, 4  ;;  %v610_v19 = vmul.f32 %v796_v7, %v1302_v10 }
  0x82   : > { %v592_v18 = vadd.f32 %v591_v11, %v590_v63  ;;  %v546_v21 = vadd.f32 %v545_v13, %v536_v61  ;;  %v564_v22 = vrot.slane %v563_v1, 1  ;;  %v584_v24 = vrot.slane %v583_v16, 2 }
  0x83   : > { %v574_v23 = vrot.slane %v573_v15, 1  ;;  %v555_v25 = vadd.f32 %v554_v17, %v553_v9  ;;  %v602_v6 = vadd.f32 %v601_v4, %v600_v12  ;;  %v611_v27 = vrot.slane %v610_v19, 4 }
  0x84   : > { %v593_v26 = vrot.slane %v592_v18, 2  ;;  %v565_v28 = vadd.f32 %v564_v22, %v563_v1  ;;  %v585_v30 = vadd.f32 %v584_v24, %v583_v16  ;;  %v620_v31 = vmul.f32 %v797_v20, %v1306_v14 }
  0x85   : > { %v575_v29 = vadd.f32 %v574_v23, %v573_v15  ;;  %v556_v32 = vadd.f32 %v555_v25, %v546_v21  ;;  %v603_v34 = vrot.slane %v602_v6, 2  ;;  %v612_v10 = vadd.f32 %v611_v27, %v610_v19 }
  0x86   : > { %v594_v33 = vadd.f32 %v593_v26, %v592_v18  ;;  %v586_v35 = vrot.slane %v585_v30, 1  ;;  %v621_v36 = vrot.slane %v620_v31, 4 }
  0x87   : > { %v566_v37 = vadd.f32 %v565_v28, %v556_v32  ;;  %v604_v39 = vadd.f32 %v603_v34, %v602_v6  ;;  %v613_v40 = vrot.slane %v612_v10, 2 }
  0x88   : > { %v595_v38 = vrot.slane %v594_v33, 1  ;;  %v587_v41 = vadd.f32 %v586_v35, %v585_v30  ;;  %v622_v42 = vadd.f32 %v621_v36, %v620_v31 }
  0x89   : > { %v576_v43 = vadd.f32 %v575_v29, %v566_v37  ;;  %v605_v45 = vrot.slane %v604_v39, 1  ;;  %v614_v46 = vadd.f32 %v613_v40, %v612_v10 }
  0x8a   : > { %v596_v44 = vadd.f32 %v595_v38, %v594_v33  ;;  %v623_v14 = vrot.slane %v622_v42, 2 }
  0x8b   : > { %577 = vst [vmem:[%s1331_s8 + $0x6] sm:$0x1] %v576_v43  ;;  %v606_v48 = vadd.f32 %v605_v45, %v604_v39  ;;  %v615_v49 = vrot.slane %v614_v46, 1 }
  0x8c   : > { %v597_v47 = vadd.f32 %v596_v44, %v587_v41  ;;  %v624_v50 = vadd.f32 %v623_v14, %v622_v42 }
  0x8d   : > { %v616_v52 = vadd.f32 %v615_v49, %v614_v46 }
  0x8e   : > { %v607_v51 = vadd.f32 %v606_v48, %v597_v47  ;;  %v625_v53 = vrot.slane %v624_v50, 1 }
  0x90   : > { %v617_v54 = vadd.f32 %v616_v52, %v607_v51  ;;  %v626_v55 = vadd.f32 %v625_v53, %v624_v50 }
  0x92   : > { %v627_v56 = vadd.f32 %v626_v55, %v617_v54 }
  0x94   : > { %628 = vst [vmem:[%s1331_s8 + $0x7] sm:$0x1] %v627_v56 }
  0x95   : > { %1005 = shalt.err (!%p1002_p5)
}
  0x96   : > { %812 = dma.vmem_to_hbm [thread:$0]  (%p1212_p9), %s645_s30, 128, %s647_s21, %s630_s9  }
  0x97 PF: > { %p826_p7 = scmp.ge.s32.totalorder %s1104_s19, 2  ;;  %s658_s27 = sand.u32 1, %s1076_s12  }
  0x98   : > { %s659_s28 = scalar_lea.sflag [#allocation4], %s658_s27 }
  0x99   : > { %p822_p10 = pnand %p826_p7, %p1222_p13 }
  0x9b   : > { %p823_p12 = pneg %p822_p10 }
  0x9d   : > { %1059 = dma.done.wait (%p823_p12), %s659_s28, 128  }
  0x9e   : > { %1061 = vsyncadd (%p823_p12), %s659_s28, 4294967168  ;;  %s21_s19 = sadd.s32 1, %s1104_s19   ;;  %s1465_s29 = sld [smem:[#allocation14_spill]] }
  0x9f   : > { %p18_p1 = scmp.ge.s32.totalorder %s21_s19, 6   ;;  %s1466_s15 = sld [smem:[#allocation11_spill]] }
  0xa0   : > { %s1467_s17 = sld [smem:[#allocation12_spill]]  ;;  %s1469_s9 = smov %s1068_s10 }
  0xa1   : > { %s1468_s8 = sld [smem:[#allocation13_spill]]  ;;  %s1470_s10 = smov %s1072_s11 }
  0xa2   : > { %s1471_s11 = smov %s1252_s23  ;;  %s1472_s12 = smov %s1080_s13 }
  0xa3   : > { %s1473_s13 = smov %s1084_s14  ;;  %s1475_s16 = smov %s1100_s18 }
  0xa4   : > { %s1474_s14 = smov %s1465_s29  ;;  %20 = sbr.rel (!%p18_p1) target bundleno = 13 (0xd), region = 93 }
  0xa7   : > { %s1476_s18 = smov %s1468_s8 }
  0xa9   :  { %665 = vsyncpa [#allocation3], 1 }
  0xaa   :  { %667 = vsyncpa [#allocation3 + $0x1], 1 }
  0xab   :  { %668 = vsyncpa [#allocation6], 1 }
  0xac   :  { %670 = vsyncpa [#allocation6 + $0x1], 1 }
  0xad   :  { %671 = vsyncpa [#allocation4], 1 }
  0xae   :  { %673 = vsyncpa [#allocation4 + $0x1], 1 }

</bundles_post_ra>
